<compile_context>
chip_gen: v7x
topology: tpu7x:2x2x1
jax: 0.10.0
libtpu: 0.0.40
codegen_flags: <defaults>
</compile_context>

<pallas_src>
import jax
import jax.numpy as jnp
from jax.experimental import pallas as pl
from jax.experimental.pallas import tpu as pltpu


def reward_disc_kernel(tok_ref, mask_ref, len_ref, w_ref, b_ref,
                       emb_ref, logits_ref,
                       acc_ref):
    """One (batch-tile, seq-tile) grid step.

    tok_ref   : [TB, TS, H]  token embeddings (encoder output stand-in)
    mask_ref  : [TB, TS, 1]  attention mask in token dtype (1 = token, 0 = pad)
    len_ref   : [TB, 1] f32  per-row token counts (precomputed in wrapper)
    w_ref     : [H, C]       classifier weight (pre-transposed)
    b_ref     : [1, C]       classifier bias
    emb_ref   : [TB, H]      sentence embedding (written on last S step)
    logits_ref: [TB, C]      logits             (written on last S step)
    acc_ref   : [TB, H] f32  masked-sum accumulator (VMEM scratch)
    """
    s = pl.program_id(1)

    @pl.when(s == 0)
    def _init():
        acc_ref[...] = jnp.zeros_like(acc_ref)

    # Masked sum over the sequence tile.  The [TB, TS, 1] mask matches the
    # token layout (H on lanes), so the broadcast is a lane splat; the f32
    # upcast is fused into the accumulating reduction.
    acc_ref[...] += jnp.sum(tok_ref[...] * mask_ref[...], axis=1,
                            dtype=jnp.float32)

    @pl.when(s == pl.num_programs(1) - 1)
    def _finalize():
        # Masked mean pooling (divide once, outside the reduction loop).
        cnt = jnp.maximum(len_ref[...], 1.0)          # [TB, 1]
        emb = acc_ref[...] / cnt
        emb_ref[...] = emb.astype(emb_ref.dtype)
        # Dropout (eval mode) is identity; classifier: emb @ W^T + b (MXU).
        logits = jnp.dot(emb, w_ref[...], preferred_element_type=jnp.float32)
        logits_ref[...] = (logits + b_ref[...]).astype(logits_ref.dtype)


def _round_up(x, m):
    return ((x + m - 1) // m) * m


def _vmem_sizing():
    """Per-generation scoped-VMEM limit (bytes): ~85% of physical capacity."""
    cap = 64 << 20  # conservative fallback = v7x per-TC VMEM
    try:
        cap = int(getattr(pltpu.get_tpu_info(), "vmem_capacity_bytes", cap))
    except Exception:
        pass
    return max(32 << 20, int(cap * 0.85))


def _pick_batch_tile(b_pad, tb_req):
    """Multiple of 8 dividing b_pad; keep >=2 batch programs when b_pad>=16
    so v7x's two TensorCores both get work on the 'parallel' axis."""
    cap = b_pad // 2 if b_pad >= 16 else b_pad
    tb = min(max(8, (tb_req // 8) * 8), cap)
    while b_pad % tb != 0:
        tb -= 8
    return max(tb, 8)


def _pick_seq_tile(S, H, tb, itemsize, ts_req, tile_budget_bytes):
    """Largest multiple of 128 such that the double-buffered token + mask
    tiles fit in the VMEM tile budget (and no larger than needed)."""
    s_ceil = _round_up(S, 128)
    per_ts_bytes = 2 * tb * (H + 1) * itemsize        # double-buffered tok+mask
    ts_budget = max(128, (tile_budget_bytes // per_ts_bytes) // 128 * 128)
    ts = min(_round_up(max(ts_req, 128), 128), ts_budget, s_ceil)
    return max(ts, 128)


def reward_discriminator_forward(tok_emb, attn_mask, w_cls, b_cls,
                                 *, tb=8, ts=1024):
    """Eval-mode forward of SentenceTransformerRewardDiscriminator.

    tok_emb  : [B, S, H] encoder token-level output (f32 or bf16)
    attn_mask: [B, S]    attention mask (1 = token, 0 = pad)
    w_cls    : [C, H]    nn.Linear weight (PyTorch layout)
    b_cls    : [C]       nn.Linear bias

    `tb`/`ts` are requests; they are clamped so the (double-buffered) token +
    mask tiles fit the per-generation VMEM budget, and B/S are padded (mask=0)
    instead of falling back to full-extent blocks.
    """
    B, S, H = tok_emb.shape
    C = w_cls.shape[0]
    dtype = tok_emb.dtype
    itemsize = jnp.dtype(dtype).itemsize

    # --- per-generation VMEM sizing ---------------------------------------
    vmem_limit = _vmem_sizing()
    tile_budget = vmem_limit - (8 << 20)      # headroom for weights/outputs/scratch

    # --- tile selection (pad, never full-extent fallback) ------------------
    b_pad = _round_up(B, 8)
    tb = _pick_batch_tile(b_pad, tb)
    ts = _pick_seq_tile(S, H, tb, itemsize, ts, tile_budget)
    s_pad = _round_up(S, ts)

    # --- wrapper preprocessing ---------------------------------------------
    mask_f32 = attn_mask.astype(jnp.float32)
    lengths = jnp.sum(mask_f32, axis=1, keepdims=True)          # [B, 1] f32
    mask3 = attn_mask.astype(dtype)[:, :, None]                 # [B, S, 1]

    if s_pad != S:
        tok_emb = jnp.pad(tok_emb, ((0, 0), (0, s_pad - S), (0, 0)))
        mask3 = jnp.pad(mask3, ((0, 0), (0, s_pad - S), (0, 0)))
    if b_pad != B:
        tok_emb = jnp.pad(tok_emb, ((0, b_pad - B), (0, 0), (0, 0)))
        mask3 = jnp.pad(mask3, ((0, b_pad - B), (0, 0), (0, 0)))
        lengths = jnp.pad(lengths, ((0, b_pad - B), (0, 0)))

    w_t = jnp.transpose(w_cls)                                   # [H, C]
    b2 = b_cls.reshape(1, C)

    cost = pl.CostEstimate(
        flops=2 * b_pad * s_pad * H + 2 * b_pad * H * C,
        transcendentals=0,
        bytes_accessed=(b_pad * s_pad * H * itemsize          # tokens
                        + b_pad * s_pad * itemsize            # mask
                        + b_pad * 4                           # lengths
                        + H * C * 4 + C * 4                   # classifier
                        + b_pad * H * 4 + b_pad * C * 4),     # outputs
    )

    emb, logits = pl.pallas_call(
        reward_disc_kernel,
        out_shape=(
            jax.ShapeDtypeStruct((b_pad, H), jnp.float32),
            jax.ShapeDtypeStruct((b_pad, C), jnp.float32),
        ),
        grid_spec=pltpu.PrefetchScalarGridSpec(
            num_scalar_prefetch=0,
            grid=(b_pad // tb, s_pad // ts),       # reduction (S) axis last
            in_specs=[
                pl.BlockSpec((tb, ts, H), lambda i, s: (i, s, 0)),   # tokens
                pl.BlockSpec((tb, ts, 1), lambda i, s: (i, s, 0)),   # mask
                pl.BlockSpec((tb, 1), lambda i, s: (i, 0)),          # lengths
                pl.BlockSpec((H, C), lambda i, s: (0, 0)),           # weight
                pl.BlockSpec((1, C), lambda i, s: (0, 0)),           # bias
            ],
            out_specs=(
                pl.BlockSpec((tb, H), lambda i, s: (i, 0)),
                pl.BlockSpec((tb, C), lambda i, s: (i, 0)),
            ),
            scratch_shapes=[
                pltpu.VMEM((tb, H), jnp.float32),    # masked-sum accumulator
            ],
        ),
        compiler_params=pltpu.CompilerParams(
            dimension_semantics=("parallel", "arbitrary"),
            vmem_limit_bytes=vmem_limit,
        ),
        cost_estimate=cost,
    )(tok_emb, mask3, lengths, w_t, b2)

    return {"sentence_embedding": emb[:B], "logits": logits[:B]}


if __name__ == "__main__":
    # Small shapes that still exercise padding (B=6 -> 8, S=200 -> 256) and a
    # multi-step sequence reduction (ts=128 -> 2 seq grid steps).
    B, S, H, C = 6, 200, 128, 4
    key = jax.random.PRNGKey(0)
    k_tok, k_w, k_b = jax.random.split(key, 3)

    tok_emb = jax.random.normal(k_tok, (B, S, H), dtype=jnp.float32)
    # Ragged batch: mean pooling must be masked, as in SentenceTransformer.
    lengths = jnp.array([200, 160, 200, 96, 32, 7], jnp.int32)
    attn_mask = (jnp.arange(S)[None, :] < lengths[:, None]).astype(jnp.float32)

    # nn.Linear(H, C) deterministic init (uniform, like PyTorch's bound).
    bound = 1.0 / (H ** 0.5)
    w_cls = jax.random.uniform(k_w, (C, H), jnp.float32, -bound, bound)
    b_cls = jax.random.uniform(k_b, (C,), jnp.float32, -bound, bound)

    out = reward_discriminator_forward(tok_emb, attn_mask, w_cls, b_cls,
                                       tb=8, ts=128)
    jax.block_until_ready(out)

    # Pure-JAX reference check (masked mean pooling + linear classifier).
    cnt = jnp.maximum(attn_mask.sum(axis=1, keepdims=True), 1.0)
    emb_ref = (tok_emb * attn_mask[:, :, None]).sum(axis=1) / cnt
    logits_ref = emb_ref @ w_cls.T + b_cls
    assert out["sentence_embedding"].shape == (B, H)
    assert out["logits"].shape == (B, C)
    assert jnp.allclose(out["sentence_embedding"], emb_ref, atol=1e-4, rtol=1e-4)
    assert jnp.allclose(out["logits"], logits_ref, atol=1e-4, rtol=1e-4)

    print("KERNEL_OK")
</pallas_src>

<mosaic_0001>
module attributes {stable_mosaic.version = 11 : i64} {
  func.func @reward_disc_kernel(%arg0: i32, %arg1: i32, %arg2: memref<8x128x128xf32, #tpu.memory_space<vmem>>, %arg3: memref<8x128x1xf32, #tpu.memory_space<vmem>>, %arg4: memref<8x1xf32, #tpu.memory_space<vmem>>, %arg5: memref<128x4xf32, #tpu.memory_space<vmem>>, %arg6: memref<1x4xf32, #tpu.memory_space<vmem>>, %arg7: memref<8x128xf32, #tpu.memory_space<vmem>>, %arg8: memref<8x4xf32, #tpu.memory_space<vmem>>, %arg9: memref<8x128xf32, #tpu.memory_space<vmem>>) attributes {dimension_semantics = [#tpu.dimension_semantics<parallel>, #tpu.dimension_semantics<arbitrary>], iteration_bounds = array<i64: 1, 2>, scalar_prefetch = 0 : i64, scratch_operands = 1 : i64, tpu.core_type = #tpu.core_type<tc>, window_params = [{transform_indices = @transform_0, window_bounds = array<i64: 8, 128, 128>}, {transform_indices = @transform_1, window_bounds = array<i64: 8, 128, 1>}, {transform_indices = @transform_2, window_bounds = array<i64: 8, 1>}, {pipeline_mode = #tpu.pipeline_mode<synchronous>, transform_indices = @transform_3, window_bounds = array<i64: 128, 4>}, {pipeline_mode = #tpu.pipeline_mode<synchronous>, transform_indices = @transform_4, window_bounds = array<i64: 1, 4>}, {transform_indices = @transform_5, window_bounds = array<i64: 8, 128>}, {transform_indices = @transform_6, window_bounds = array<i64: 8, 4>}]} {
    %c0_i32 = arith.constant 0 : i32
    %0 = arith.cmpi eq, %arg1, %c0_i32 : i32
    %1 = arith.extui %0 : i1 to i32
    %c0_i32_0 = arith.constant 0 : i32
    %2 = arith.cmpi ne, %1, %c0_i32_0 : i32
    scf.if %2 {
      %cst_11 = arith.constant 0.000000e+00 : f32
      %14 = vector.broadcast %cst_11 : f32 to vector<8x128xf32>
      %c0_12 = arith.constant 0 : index
      %c0_13 = arith.constant 0 : index
      %15 = vector.load %arg9[%c0_12, %c0_13] : memref<8x128xf32, #tpu.memory_space<vmem>>, vector<8x128xf32>
      tpu.vector_store %arg9[%c0_12, %c0_13], %14 {strides = array<i32>} : memref<8x128xf32, #tpu.memory_space<vmem>>, vector<8x128xf32>,
    } else {
    }
    %c0 = arith.constant 0 : index
    %c0_1 = arith.constant 0 : index
    %3 = vector.load %arg9[%c0, %c0_1] : memref<8x128xf32, #tpu.memory_space<vmem>>, vector<8x128xf32>
    %c0_2 = arith.constant 0 : index
    %c0_3 = arith.constant 0 : index
    %c0_4 = arith.constant 0 : index
    %4 = vector.load %arg2[%c0_2, %c0_3, %c0_4] : memref<8x128x128xf32, #tpu.memory_space<vmem>>, vector<8x128x128xf32>
    %c0_5 = arith.constant 0 : index
    %c0_6 = arith.constant 0 : index
    %c0_7 = arith.constant 0 : index
    %5 = vector.load %arg3[%c0_5, %c0_6, %c0_7] : memref<8x128x1xf32, #tpu.memory_space<vmem>>, vector<8x128x1xf32>
    %6 = vector.broadcast %5 : vector<8x128x1xf32> to vector<8x128x128xf32>
    %7 = arith.mulf %4, %6 : vector<8x128x128xf32>
    %cst = arith.constant dense<0.000000e+00> : vector<8x128xf32>
    %8 = vector.multi_reduction <add>, %7, %cst [1] : vector<8x128x128xf32> to vector<8x128xf32>
    %9 = arith.addf %3, %8 : vector<8x128xf32>
    %c0_8 = arith.constant 0 : index
    %c0_9 = arith.constant 0 : index
    %10 = vector.load %arg9[%c0_8, %c0_9] : memref<8x128xf32, #tpu.memory_space<vmem>>, vector<8x128xf32>
    tpu.vector_store %arg9[%c0_8, %c0_9], %9 {strides = array<i32>} : memref<8x128xf32, #tpu.memory_space<vmem>>, vector<8x128xf32>,
    %c1_i32 = arith.constant 1 : i32
    %11 = arith.cmpi eq, %arg1, %c1_i32 : i32
    %12 = arith.extui %11 : i1 to i32
    %c0_i32_10 = arith.constant 0 : i32
    %13 = arith.cmpi ne, %12, %c0_i32_10 : i32
    scf.if %13 {
      %c0_11 = arith.constant 0 : index
      %c0_12 = arith.constant 0 : index
      %14 = vector.load %arg4[%c0_11, %c0_12] : memref<8x1xf32, #tpu.memory_space<vmem>>, vector<8x1xf32>
      %cst_13 = arith.constant 1.000000e+00 : f32
      %15 = vector.broadcast %cst_13 : f32 to vector<8x1xf32>
      %16 = arith.maximumf %14, %15 : vector<8x1xf32>
      %c0_14 = arith.constant 0 : index
      %c0_15 = arith.constant 0 : index
      %17 = vector.load %arg9[%c0_14, %c0_15] : memref<8x128xf32, #tpu.memory_space<vmem>>, vector<8x128xf32>
      %18 = vector.broadcast %16 : vector<8x1xf32> to vector<8x128xf32>
      %19 = arith.divf %17, %18 : vector<8x128xf32>
      %c0_16 = arith.constant 0 : index
      %c0_17 = arith.constant 0 : index
      %20 = vector.load %arg7[%c0_16, %c0_17] : memref<8x128xf32, #tpu.memory_space<vmem>>, vector<8x128xf32>
      tpu.vector_store %arg7[%c0_16, %c0_17], %19 {strides = array<i32>} : memref<8x128xf32, #tpu.memory_space<vmem>>, vector<8x128xf32>,
      %c0_18 = arith.constant 0 : index
      %c0_19 = arith.constant 0 : index
      %21 = vector.load %arg5[%c0_18, %c0_19] : memref<128x4xf32, #tpu.memory_space<vmem>>, vector<128x4xf32>
      %cst_20 = arith.constant dense<0.000000e+00> : vector<8x4xf32>
      %22 = tpu.matmul %19, %21, %cst_20 {dimension_numbers = #tpu.dot_dimension_numbers<[1], [0], [0], [1], [0, 0, 1, 1], [], []>} : vector<8x128xf32>, vector<128x4xf32>, vector<8x4xf32> -> vector<8x4xf32>
      %c0_21 = arith.constant 0 : index
      %c0_22 = arith.constant 0 : index
      %23 = vector.load %arg6[%c0_21, %c0_22] : memref<1x4xf32, #tpu.memory_space<vmem>>, vector<1x4xf32>
      %24 = vector.broadcast %23 : vector<1x4xf32> to vector<8x4xf32>
      %25 = arith.addf %22, %24 : vector<8x4xf32>
      %c0_23 = arith.constant 0 : index
      %c0_24 = arith.constant 0 : index
      %26 = vector.load %arg8[%c0_23, %c0_24] : memref<8x4xf32, #tpu.memory_space<vmem>>, vector<8x4xf32>
      tpu.vector_store %arg8[%c0_23, %c0_24], %25 {strides = array<i32>} : memref<8x4xf32, #tpu.memory_space<vmem>>, vector<8x4xf32>,
    } else {
    }
    return
  }
  func.func @transform_0(%arg0: i32, %arg1: i32) -> (i32, i32, i32) {
    %c0_i32 = arith.constant 0 : i32
    %c0_i32_0 = arith.constant 0 : i32
    return %arg0, %arg1, %c0_i32 : i32, i32, i32
  }
  func.func @transform_1(%arg0: i32, %arg1: i32) -> (i32, i32, i32) {
    %c0_i32 = arith.constant 0 : i32
    %c0_i32_0 = arith.constant 0 : i32
    return %arg0, %arg1, %c0_i32 : i32, i32, i32
  }
  func.func @transform_2(%arg0: i32, %arg1: i32) -> (i32, i32) {
    %c0_i32 = arith.constant 0 : i32
    %c0_i32_0 = arith.constant 0 : i32
    return %arg0, %c0_i32 : i32, i32
  }
  func.func @transform_3(%arg0: i32, %arg1: i32) -> (i32, i32) {
    %c0_i32 = arith.constant 0 : i32
    %c0_i32_0 = arith.constant 0 : i32
    %c0_i32_1 = arith.constant 0 : i32
    return %c0_i32, %c0_i32_0 : i32, i32
  }
  func.func @transform_4(%arg0: i32, %arg1: i32) -> (i32, i32) {
    %c0_i32 = arith.constant 0 : i32
    %c0_i32_0 = arith.constant 0 : i32
    %c0_i32_1 = arith.constant 0 : i32
    return %c0_i32, %c0_i32_0 : i32, i32
  }
  func.func @transform_5(%arg0: i32, %arg1: i32) -> (i32, i32) {
    %c0_i32 = arith.constant 0 : i32
    %c0_i32_0 = arith.constant 0 : i32
    return %arg0, %c0_i32 : i32, i32
  }
  func.func @transform_6(%arg0: i32, %arg1: i32) -> (i32, i32) {
    %c0_i32 = arith.constant 0 : i32
    %c0_i32_0 = arith.constant 0 : i32
    return %arg0, %c0_i32 : i32, i32
  }
}

</mosaic_0001>

<bundles_post_ra>
// kernel: tpu_custom_call.1
= control target key start
LH: loop header
LB: loop body
LE: loop exit
PB: predicated region body
PF: predicated region fallthrough
CT: control target
= control target key end

     0   :  { %12 = vsyncpa [#allocation6], 0  ;;  %s3137_s21 = smov 0   ;;  %s3139_s22 = smov 0   ;;  %s4143_s0 = inlined_call_operand.vmem [shape: f32[8,256,128], index: 0, kind: input, shape index: {}]   ;;  %s4144_s1 = inlined_call_operand.vmem [shape: f32[8,256,1], index: 1, kind: input, shape index: {}]   ;;  %s4145_s2 = inlined_call_operand.vmem [shape: f32[8,1], index: 2, kind: input, shape index: {}]   ;;  %s4146_s3 = inlined_call_operand.vmem [shape: f32[128,4], index: 3, kind: input, shape index: {}]   ;;  %s4147_s4 = inlined_call_operand.vmem [shape: f32[1,4], index: 4, kind: input, shape index: {}]   ;;  %s4148_s5 = inlined_call_operand.hbm [shape: f32[8,128], index: 5, kind: output, shape index: {0}]   ;;  %s4149_s6 = inlined_call_operand.vmem [shape: f32[8,4], index: 6, kind: output, shape index: {1}]  }
   0x1   :  { %s3141_s23 = smov 0   ;;  %s3143_s24 = smov 0  }
   0x2   :  { %s3145_s25 = smov 0  }
   0x3 LB: > { %s2868_s26 = sadd.s32 4294967295, %s3093_s25   ;;  %s27_s27 = sadd.s32 1, %s3089_s24  ;;  %s3093_s25 = sphi %s3145_s25, %s18_s25   ;;  %s3089_s24 = sphi %s3143_s24, %s4155_s24   ;;  %s3085_s23 = sphi %s3141_s23, %s4154_s23   ;;  %s3081_s22 = sphi %s3139_s22, %s4153_s22   ;;  %s3077_s21 = sphi %s3137_s21, %s4152_s21  }
   0x4   : > { %p28_p0 = scmp.ge.s32.totalorder %s27_s27, 2  ;;  %p46_p1 = scmp.ne.s32.totalorder %s3081_s22, %s3077_s21 }
   0x5   : > { %p47_p2 = scmp.eq.s32.totalorder %s3093_s25, 0  ;;  %s39_s30 = sadd.s32 1, %s3081_s22 }
   0x6   : > { %s4157_s27 = smov (%p28_p0, %s27_s27), 0  ;;  %p2871_p5 = scmp.ge.s32.totalorder %s3093_s25, 2 }
   0x7   : > { %p3169_p3 = por %p47_p2, %p46_p1  ;;  %s35_s29 = ssub.s32 %s3089_s24, %s4157_s27 }
   0x8   : > { %p37_p4 = scmp.eq.s32.totalorder %s35_s29, 0  ;;  %233 = sbr.rel (%p2871_p5) target bundleno = 151 (0x97), region = 28 }
   0xa   : > { %s3177_s7 = scalar_select %p37_p4, %s3081_s22, %s39_s30  }
   0xf   : > { %236 = sbr.rel (!%p3169_p3) target bundleno = 83 (0x53), region = 32  ;;  %s238_s8 = sand.u32 (%p3169_p3), 1, %s3081_s22  }
  0x10   : > { %s2889_s9 = sshll.u32 (%p3169_p3), %s3089_s24, 7  ;;  %s2872_s10 = sshll.u32 (%p3169_p3), %s238_s8, 10 }
  0x11   : > { %s3187_s13 = scalar_lea.vmem (%p3169_p3), %s4143_s0, %s2889_s9  ;;  %s3192_s14 = scalar_lea.vmem (%p3169_p3), [#allocation3], %s2872_s10 }
  0x12   : > { %v528_v0 = vld [vmem:[%s3187_s13] sm:$0xff] (%p3169_p3)  ;;  %v530_v1 = vld [vmem:[%s3187_s13 + $0x8] sm:$0xff] (%p3169_p3)  ;;  %v532_v2 = vld [vmem:[%s3187_s13 + $0x10] sm:$0xff] (%p3169_p3) }
  0x13   : > { %529 = vst [vmem:[%s3192_s14] sm:$0xff] (%p3169_p3), %v528_v0  ;;  %531 = vst [vmem:[%s3192_s14 + $0x8] sm:$0xff] (%p3169_p3), %v530_v1  ;;  %v534_v3 = vld [vmem:[%s3187_s13 + $0x18] sm:$0xff] (%p3169_p3)  ;;  %v536_v4 = vld [vmem:[%s3187_s13 + $0x20] sm:$0xff] (%p3169_p3) }
  0x14   : > { %533 = vst [vmem:[%s3192_s14 + $0x10] sm:$0xff] (%p3169_p3), %v532_v2  ;;  %v538_v5 = vld [vmem:[%s3187_s13 + $0x28] sm:$0xff] (%p3169_p3)  ;;  %535 = vst [vmem:[%s3192_s14 + $0x18] sm:$0xff] (%p3169_p3), %v534_v3  ;;  %v540_v6 = vld [vmem:[%s3187_s13 + $0x30] sm:$0xff] (%p3169_p3) }
  0x15   : > { %537 = vst [vmem:[%s3192_s14 + $0x20] sm:$0xff] (%p3169_p3), %v536_v4  ;;  %539 = vst [vmem:[%s3192_s14 + $0x28] sm:$0xff] (%p3169_p3), %v538_v5  ;;  %v542_v7 = vld [vmem:[%s3187_s13 + $0x38] sm:$0xff] (%p3169_p3)  ;;  %v544_v8 = vld [vmem:[%s3187_s13 + $0x40] sm:$0xff] (%p3169_p3) }
  0x16   : > { %541 = vst [vmem:[%s3192_s14 + $0x30] sm:$0xff] %v540_v6  ;;  %543 = vst [vmem:[%s3192_s14 + $0x38] sm:$0xff] %v542_v7  ;;  %v546_v9 = vld [vmem:[%s3187_s13 + $0x48] sm:$0xff]  ;;  %v548_v10 = vld [vmem:[%s3187_s13 + $0x50] sm:$0xff] }
  0x17   : > { %545 = vst [vmem:[%s3192_s14 + $0x40] sm:$0xff] %v544_v8  ;;  %v550_v11 = vld [vmem:[%s3187_s13 + $0x58] sm:$0xff]  ;;  %547 = vst [vmem:[%s3192_s14 + $0x48] sm:$0xff] %v546_v9  ;;  %v552_v12 = vld [vmem:[%s3187_s13 + $0x60] sm:$0xff] }
  0x18   : > { %549 = vst [vmem:[%s3192_s14 + $0x50] sm:$0xff] %v548_v10  ;;  %551 = vst [vmem:[%s3192_s14 + $0x58] sm:$0xff] %v550_v11  ;;  %v554_v13 = vld [vmem:[%s3187_s13 + $0x68] sm:$0xff]  ;;  %v556_v14 = vld [vmem:[%s3187_s13 + $0x70] sm:$0xff] }
  0x19   : > { %553 = vst [vmem:[%s3192_s14 + $0x60] sm:$0xff] %v552_v12  ;;  %555 = vst [vmem:[%s3192_s14 + $0x68] sm:$0xff] %v554_v13  ;;  %v558_v15 = vld [vmem:[%s3187_s13 + $0x78] sm:$0xff]  ;;  %v560_v16 = vld [vmem:[%s3187_s13 + $0x100] sm:$0xff] }
  0x1a   : > { %557 = vst [vmem:[%s3192_s14 + $0x70] sm:$0xff] %v556_v14  ;;  %v562_v17 = vld [vmem:[%s3187_s13 + $0x108] sm:$0xff]  ;;  %559 = vst [vmem:[%s3192_s14 + $0x78] sm:$0xff] %v558_v15  ;;  %v564_v18 = vld [vmem:[%s3187_s13 + $0x110] sm:$0xff] }
  0x1b   : > { %561 = vst [vmem:[%s3192_s14 + $0x80] sm:$0xff] %v560_v16  ;;  %563 = vst [vmem:[%s3192_s14 + $0x88] sm:$0xff] %v562_v17  ;;  %v566_v19 = vld [vmem:[%s3187_s13 + $0x118] sm:$0xff]  ;;  %v568_v20 = vld [vmem:[%s3187_s13 + $0x120] sm:$0xff] }
  0x1c   : > { %565 = vst [vmem:[%s3192_s14 + $0x90] sm:$0xff] %v564_v18  ;;  %567 = vst [vmem:[%s3192_s14 + $0x98] sm:$0xff] %v566_v19  ;;  %v570_v21 = vld [vmem:[%s3187_s13 + $0x128] sm:$0xff]  ;;  %v572_v22 = vld [vmem:[%s3187_s13 + $0x130] sm:$0xff] }
  0x1d   : > { %569 = vst [vmem:[%s3192_s14 + $0xa0] sm:$0xff] %v568_v20  ;;  %v574_v23 = vld [vmem:[%s3187_s13 + $0x138] sm:$0xff]  ;;  %571 = vst [vmem:[%s3192_s14 + $0xa8] sm:$0xff] %v570_v21  ;;  %v576_v24 = vld [vmem:[%s3187_s13 + $0x140] sm:$0xff] }
  0x1e   : > { %573 = vst [vmem:[%s3192_s14 + $0xb0] sm:$0xff] %v572_v22  ;;  %575 = vst [vmem:[%s3192_s14 + $0xb8] sm:$0xff] %v574_v23  ;;  %v578_v25 = vld [vmem:[%s3187_s13 + $0x148] sm:$0xff]  ;;  %v580_v26 = vld [vmem:[%s3187_s13 + $0x150] sm:$0xff] }
  0x1f   : > { %577 = vst [vmem:[%s3192_s14 + $0xc0] sm:$0xff] %v576_v24  ;;  %579 = vst [vmem:[%s3192_s14 + $0xc8] sm:$0xff] %v578_v25  ;;  %v582_v27 = vld [vmem:[%s3187_s13 + $0x158] sm:$0xff]  ;;  %v584_v28 = vld [vmem:[%s3187_s13 + $0x160] sm:$0xff] }
  0x20   : > { %581 = vst [vmem:[%s3192_s14 + $0xd0] sm:$0xff] %v580_v26  ;;  %v586_v29 = vld [vmem:[%s3187_s13 + $0x168] sm:$0xff]  ;;  %583 = vst [vmem:[%s3192_s14 + $0xd8] sm:$0xff] %v582_v27  ;;  %v588_v30 = vld [vmem:[%s3187_s13 + $0x170] sm:$0xff] }
  0x21   : > { %585 = vst [vmem:[%s3192_s14 + $0xe0] sm:$0xff] %v584_v28  ;;  %587 = vst [vmem:[%s3192_s14 + $0xe8] sm:$0xff] %v586_v29  ;;  %v590_v31 = vld [vmem:[%s3187_s13 + $0x178] sm:$0xff]  ;;  %v592_v32 = vld [vmem:[%s3187_s13 + $0x200] sm:$0xff] }
  0x22   : > { %589 = vst [vmem:[%s3192_s14 + $0xf0] sm:$0xff] %v588_v30  ;;  %591 = vst [vmem:[%s3192_s14 + $0xf8] sm:$0xff] %v590_v31  ;;  %v594_v33 = vld [vmem:[%s3187_s13 + $0x208] sm:$0xff]  ;;  %v596_v34 = vld [vmem:[%s3187_s13 + $0x210] sm:$0xff] }
  0x23   : > { %593 = vst [vmem:[%s3192_s14 + $0x100] sm:$0xff] %v592_v32  ;;  %v598_v35 = vld [vmem:[%s3187_s13 + $0x218] sm:$0xff]  ;;  %595 = vst [vmem:[%s3192_s14 + $0x108] sm:$0xff] %v594_v33  ;;  %v600_v36 = vld [vmem:[%s3187_s13 + $0x220] sm:$0xff] }
  0x24   : > { %597 = vst [vmem:[%s3192_s14 + $0x110] sm:$0xff] %v596_v34  ;;  %599 = vst [vmem:[%s3192_s14 + $0x118] sm:$0xff] %v598_v35  ;;  %v602_v37 = vld [vmem:[%s3187_s13 + $0x228] sm:$0xff]  ;;  %v604_v38 = vld [vmem:[%s3187_s13 + $0x230] sm:$0xff] }
  0x25   : > { %601 = vst [vmem:[%s3192_s14 + $0x120] sm:$0xff] %v600_v36  ;;  %603 = vst [vmem:[%s3192_s14 + $0x128] sm:$0xff] %v602_v37  ;;  %v606_v39 = vld [vmem:[%s3187_s13 + $0x238] sm:$0xff]  ;;  %v608_v40 = vld [vmem:[%s3187_s13 + $0x240] sm:$0xff] }
  0x26   : > { %605 = vst [vmem:[%s3192_s14 + $0x130] sm:$0xff] %v604_v38  ;;  %v610_v41 = vld [vmem:[%s3187_s13 + $0x248] sm:$0xff]  ;;  %607 = vst [vmem:[%s3192_s14 + $0x138] sm:$0xff] %v606_v39  ;;  %v612_v42 = vld [vmem:[%s3187_s13 + $0x250] sm:$0xff] }
  0x27   : > { %609 = vst [vmem:[%s3192_s14 + $0x140] sm:$0xff] %v608_v40  ;;  %611 = vst [vmem:[%s3192_s14 + $0x148] sm:$0xff] %v610_v41  ;;  %v614_v43 = vld [vmem:[%s3187_s13 + $0x258] sm:$0xff]  ;;  %v616_v44 = vld [vmem:[%s3187_s13 + $0x260] sm:$0xff] }
  0x28   : > { %613 = vst [vmem:[%s3192_s14 + $0x150] sm:$0xff] %v612_v42  ;;  %615 = vst [vmem:[%s3192_s14 + $0x158] sm:$0xff] %v614_v43  ;;  %v618_v45 = vld [vmem:[%s3187_s13 + $0x268] sm:$0xff]  ;;  %v620_v46 = vld [vmem:[%s3187_s13 + $0x270] sm:$0xff] }
  0x29   : > { %617 = vst [vmem:[%s3192_s14 + $0x160] sm:$0xff] %v616_v44  ;;  %v622_v47 = vld [vmem:[%s3187_s13 + $0x278] sm:$0xff]  ;;  %619 = vst [vmem:[%s3192_s14 + $0x168] sm:$0xff] %v618_v45  ;;  %v624_v48 = vld [vmem:[%s3187_s13 + $0x300] sm:$0xff] }
  0x2a   : > { %621 = vst [vmem:[%s3192_s14 + $0x170] sm:$0xff] %v620_v46  ;;  %623 = vst [vmem:[%s3192_s14 + $0x178] sm:$0xff] %v622_v47  ;;  %v626_v49 = vld [vmem:[%s3187_s13 + $0x308] sm:$0xff]  ;;  %v628_v50 = vld [vmem:[%s3187_s13 + $0x310] sm:$0xff] }
  0x2b   : > { %625 = vst [vmem:[%s3192_s14 + $0x180] sm:$0xff] %v624_v48  ;;  %627 = vst [vmem:[%s3192_s14 + $0x188] sm:$0xff] %v626_v49  ;;  %v630_v51 = vld [vmem:[%s3187_s13 + $0x318] sm:$0xff]  ;;  %v632_v52 = vld [vmem:[%s3187_s13 + $0x320] sm:$0xff] }
  0x2c   : > { %629 = vst [vmem:[%s3192_s14 + $0x190] sm:$0xff] %v628_v50  ;;  %v634_v53 = vld [vmem:[%s3187_s13 + $0x328] sm:$0xff]  ;;  %631 = vst [vmem:[%s3192_s14 + $0x198] sm:$0xff] %v630_v51  ;;  %v636_v54 = vld [vmem:[%s3187_s13 + $0x330] sm:$0xff] }
  0x2d   : > { %633 = vst [vmem:[%s3192_s14 + $0x1a0] sm:$0xff] %v632_v52  ;;  %635 = vst [vmem:[%s3192_s14 + $0x1a8] sm:$0xff] %v634_v53  ;;  %v638_v55 = vld [vmem:[%s3187_s13 + $0x338] sm:$0xff]  ;;  %v640_v56 = vld [vmem:[%s3187_s13 + $0x340] sm:$0xff] }
  0x2e   : > { %637 = vst [vmem:[%s3192_s14 + $0x1b0] sm:$0xff] %v636_v54  ;;  %639 = vst [vmem:[%s3192_s14 + $0x1b8] sm:$0xff] %v638_v55  ;;  %v642_v57 = vld [vmem:[%s3187_s13 + $0x348] sm:$0xff]  ;;  %v644_v58 = vld [vmem:[%s3187_s13 + $0x350] sm:$0xff] }
  0x2f   : > { %641 = vst [vmem:[%s3192_s14 + $0x1c0] sm:$0xff] %v640_v56  ;;  %v646_v59 = vld [vmem:[%s3187_s13 + $0x358] sm:$0xff]  ;;  %643 = vst [vmem:[%s3192_s14 + $0x1c8] sm:$0xff] %v642_v57  ;;  %v648_v60 = vld [vmem:[%s3187_s13 + $0x360] sm:$0xff] }
  0x30   : > { %645 = vst [vmem:[%s3192_s14 + $0x1d0] sm:$0xff] %v644_v58  ;;  %647 = vst [vmem:[%s3192_s14 + $0x1d8] sm:$0xff] %v646_v59  ;;  %v650_v61 = vld [vmem:[%s3187_s13 + $0x368] sm:$0xff]  ;;  %v652_v62 = vld [vmem:[%s3187_s13 + $0x370] sm:$0xff] }
  0x31   : > { %649 = vst [vmem:[%s3192_s14 + $0x1e0] sm:$0xff] %v648_v60  ;;  %651 = vst [vmem:[%s3192_s14 + $0x1e8] sm:$0xff] %v650_v61  ;;  %v654_v63 = vld [vmem:[%s3187_s13 + $0x378] sm:$0xff]  ;;  %v656_v0 = vld [vmem:[%s3187_s13 + $0x400] sm:$0xff] }
  0x32   : > { %653 = vst [vmem:[%s3192_s14 + $0x1f0] sm:$0xff] %v652_v62  ;;  %v658_v1 = vld [vmem:[%s3187_s13 + $0x408] sm:$0xff]  ;;  %655 = vst [vmem:[%s3192_s14 + $0x1f8] sm:$0xff] %v654_v63  ;;  %v660_v2 = vld [vmem:[%s3187_s13 + $0x410] sm:$0xff] }
  0x33   : > { %657 = vst [vmem:[%s3192_s14 + $0x200] sm:$0xff] %v656_v0  ;;  %659 = vst [vmem:[%s3192_s14 + $0x208] sm:$0xff] %v658_v1  ;;  %v662_v3 = vld [vmem:[%s3187_s13 + $0x418] sm:$0xff]  ;;  %v664_v4 = vld [vmem:[%s3187_s13 + $0x420] sm:$0xff] }
  0x34   : > { %661 = vst [vmem:[%s3192_s14 + $0x210] sm:$0xff] %v660_v2  ;;  %663 = vst [vmem:[%s3192_s14 + $0x218] sm:$0xff] %v662_v3  ;;  %v666_v5 = vld [vmem:[%s3187_s13 + $0x428] sm:$0xff]  ;;  %v668_v6 = vld [vmem:[%s3187_s13 + $0x430] sm:$0xff] }
  0x35   : > { %665 = vst [vmem:[%s3192_s14 + $0x220] sm:$0xff] %v664_v4  ;;  %v670_v7 = vld [vmem:[%s3187_s13 + $0x438] sm:$0xff]  ;;  %667 = vst [vmem:[%s3192_s14 + $0x228] sm:$0xff] %v666_v5  ;;  %v672_v8 = vld [vmem:[%s3187_s13 + $0x440] sm:$0xff] }
  0x36   : > { %669 = vst [vmem:[%s3192_s14 + $0x230] sm:$0xff] %v668_v6  ;;  %671 = vst [vmem:[%s3192_s14 + $0x238] sm:$0xff] %v670_v7  ;;  %v674_v9 = vld [vmem:[%s3187_s13 + $0x448] sm:$0xff]  ;;  %v676_v10 = vld [vmem:[%s3187_s13 + $0x450] sm:$0xff] }
  0x37   : > { %673 = vst [vmem:[%s3192_s14 + $0x240] sm:$0xff] %v672_v8  ;;  %675 = vst [vmem:[%s3192_s14 + $0x248] sm:$0xff] %v674_v9  ;;  %v678_v11 = vld [vmem:[%s3187_s13 + $0x458] sm:$0xff]  ;;  %v680_v12 = vld [vmem:[%s3187_s13 + $0x460] sm:$0xff] }
  0x38   : > { %677 = vst [vmem:[%s3192_s14 + $0x250] sm:$0xff] %v676_v10  ;;  %v682_v13 = vld [vmem:[%s3187_s13 + $0x468] sm:$0xff]  ;;  %679 = vst [vmem:[%s3192_s14 + $0x258] sm:$0xff] %v678_v11  ;;  %v684_v14 = vld [vmem:[%s3187_s13 + $0x470] sm:$0xff] }
  0x39   : > { %681 = vst [vmem:[%s3192_s14 + $0x260] sm:$0xff] %v680_v12  ;;  %683 = vst [vmem:[%s3192_s14 + $0x268] sm:$0xff] %v682_v13  ;;  %v686_v15 = vld [vmem:[%s3187_s13 + $0x478] sm:$0xff]  ;;  %v688_v16 = vld [vmem:[%s3187_s13 + $0x500] sm:$0xff] }
  0x3a   : > { %685 = vst [vmem:[%s3192_s14 + $0x270] sm:$0xff] %v684_v14  ;;  %687 = vst [vmem:[%s3192_s14 + $0x278] sm:$0xff] %v686_v15  ;;  %v690_v17 = vld [vmem:[%s3187_s13 + $0x508] sm:$0xff]  ;;  %v692_v18 = vld [vmem:[%s3187_s13 + $0x510] sm:$0xff] }
  0x3b   : > { %689 = vst [vmem:[%s3192_s14 + $0x280] sm:$0xff] %v688_v16  ;;  %v694_v19 = vld [vmem:[%s3187_s13 + $0x518] sm:$0xff]  ;;  %691 = vst [vmem:[%s3192_s14 + $0x288] sm:$0xff] %v690_v17  ;;  %v696_v20 = vld [vmem:[%s3187_s13 + $0x520] sm:$0xff] }
  0x3c   : > { %693 = vst [vmem:[%s3192_s14 + $0x290] sm:$0xff] %v692_v18  ;;  %695 = vst [vmem:[%s3192_s14 + $0x298] sm:$0xff] %v694_v19  ;;  %v698_v21 = vld [vmem:[%s3187_s13 + $0x528] sm:$0xff]  ;;  %v700_v22 = vld [vmem:[%s3187_s13 + $0x530] sm:$0xff] }
  0x3d   : > { %697 = vst [vmem:[%s3192_s14 + $0x2a0] sm:$0xff] %v696_v20  ;;  %699 = vst [vmem:[%s3192_s14 + $0x2a8] sm:$0xff] %v698_v21  ;;  %v702_v23 = vld [vmem:[%s3187_s13 + $0x538] sm:$0xff]  ;;  %v704_v24 = vld [vmem:[%s3187_s13 + $0x540] sm:$0xff] }
  0x3e   : > { %701 = vst [vmem:[%s3192_s14 + $0x2b0] sm:$0xff] %v700_v22  ;;  %v706_v25 = vld [vmem:[%s3187_s13 + $0x548] sm:$0xff]  ;;  %703 = vst [vmem:[%s3192_s14 + $0x2b8] sm:$0xff] %v702_v23  ;;  %v708_v26 = vld [vmem:[%s3187_s13 + $0x550] sm:$0xff] }
  0x3f   : > { %705 = vst [vmem:[%s3192_s14 + $0x2c0] sm:$0xff] %v704_v24  ;;  %707 = vst [vmem:[%s3192_s14 + $0x2c8] sm:$0xff] %v706_v25  ;;  %v710_v27 = vld [vmem:[%s3187_s13 + $0x558] sm:$0xff]  ;;  %v712_v28 = vld [vmem:[%s3187_s13 + $0x560] sm:$0xff] }
  0x40   : > { %709 = vst [vmem:[%s3192_s14 + $0x2d0] sm:$0xff] %v708_v26  ;;  %711 = vst [vmem:[%s3192_s14 + $0x2d8] sm:$0xff] %v710_v27  ;;  %v714_v29 = vld [vmem:[%s3187_s13 + $0x568] sm:$0xff]  ;;  %v716_v30 = vld [vmem:[%s3187_s13 + $0x570] sm:$0xff] }
  0x41   : > { %713 = vst [vmem:[%s3192_s14 + $0x2e0] sm:$0xff] %v712_v28  ;;  %v718_v31 = vld [vmem:[%s3187_s13 + $0x578] sm:$0xff]  ;;  %715 = vst [vmem:[%s3192_s14 + $0x2e8] sm:$0xff] %v714_v29  ;;  %v720_v32 = vld [vmem:[%s3187_s13 + $0x600] sm:$0xff] }
  0x42   : > { %717 = vst [vmem:[%s3192_s14 + $0x2f0] sm:$0xff] %v716_v30  ;;  %719 = vst [vmem:[%s3192_s14 + $0x2f8] sm:$0xff] %v718_v31  ;;  %v722_v33 = vld [vmem:[%s3187_s13 + $0x608] sm:$0xff]  ;;  %v724_v34 = vld [vmem:[%s3187_s13 + $0x610] sm:$0xff] }
  0x43   : > { %721 = vst [vmem:[%s3192_s14 + $0x300] sm:$0xff] %v720_v32  ;;  %723 = vst [vmem:[%s3192_s14 + $0x308] sm:$0xff] %v722_v33  ;;  %v726_v35 = vld [vmem:[%s3187_s13 + $0x618] sm:$0xff]  ;;  %v728_v36 = vld [vmem:[%s3187_s13 + $0x620] sm:$0xff] }
  0x44   : > { %725 = vst [vmem:[%s3192_s14 + $0x310] sm:$0xff] %v724_v34  ;;  %v730_v37 = vld [vmem:[%s3187_s13 + $0x628] sm:$0xff]  ;;  %727 = vst [vmem:[%s3192_s14 + $0x318] sm:$0xff] %v726_v35  ;;  %v732_v38 = vld [vmem:[%s3187_s13 + $0x630] sm:$0xff] }
  0x45   : > { %729 = vst [vmem:[%s3192_s14 + $0x320] sm:$0xff] %v728_v36  ;;  %731 = vst [vmem:[%s3192_s14 + $0x328] sm:$0xff] %v730_v37  ;;  %v734_v39 = vld [vmem:[%s3187_s13 + $0x638] sm:$0xff]  ;;  %v736_v40 = vld [vmem:[%s3187_s13 + $0x640] sm:$0xff] }
  0x46   : > { %733 = vst [vmem:[%s3192_s14 + $0x330] sm:$0xff] %v732_v38  ;;  %735 = vst [vmem:[%s3192_s14 + $0x338] sm:$0xff] %v734_v39  ;;  %v738_v41 = vld [vmem:[%s3187_s13 + $0x648] sm:$0xff]  ;;  %v740_v42 = vld [vmem:[%s3187_s13 + $0x650] sm:$0xff] }
  0x47   : > { %737 = vst [vmem:[%s3192_s14 + $0x340] sm:$0xff] %v736_v40  ;;  %v742_v43 = vld [vmem:[%s3187_s13 + $0x658] sm:$0xff]  ;;  %739 = vst [vmem:[%s3192_s14 + $0x348] sm:$0xff] %v738_v41  ;;  %v744_v44 = vld [vmem:[%s3187_s13 + $0x660] sm:$0xff] }
  0x48   : > { %741 = vst [vmem:[%s3192_s14 + $0x350] sm:$0xff] %v740_v42  ;;  %743 = vst [vmem:[%s3192_s14 + $0x358] sm:$0xff] %v742_v43  ;;  %v746_v45 = vld [vmem:[%s3187_s13 + $0x668] sm:$0xff]  ;;  %v748_v46 = vld [vmem:[%s3187_s13 + $0x670] sm:$0xff] }
  0x49   : > { %745 = vst [vmem:[%s3192_s14 + $0x360] sm:$0xff] %v744_v44  ;;  %747 = vst [vmem:[%s3192_s14 + $0x368] sm:$0xff] %v746_v45  ;;  %v750_v47 = vld [vmem:[%s3187_s13 + $0x678] sm:$0xff]  ;;  %v752_v48 = vld [vmem:[%s3187_s13 + $0x700] sm:$0xff] }
  0x4a   : > { %749 = vst [vmem:[%s3192_s14 + $0x370] sm:$0xff] %v748_v46  ;;  %v754_v49 = vld [vmem:[%s3187_s13 + $0x708] sm:$0xff]  ;;  %751 = vst [vmem:[%s3192_s14 + $0x378] sm:$0xff] %v750_v47  ;;  %v756_v50 = vld [vmem:[%s3187_s13 + $0x710] sm:$0xff] }
  0x4b   : > { %753 = vst [vmem:[%s3192_s14 + $0x380] sm:$0xff] %v752_v48  ;;  %755 = vst [vmem:[%s3192_s14 + $0x388] sm:$0xff] %v754_v49  ;;  %v758_v51 = vld [vmem:[%s3187_s13 + $0x718] sm:$0xff]  ;;  %v760_v52 = vld [vmem:[%s3187_s13 + $0x720] sm:$0xff] }
  0x4c   : > { %757 = vst [vmem:[%s3192_s14 + $0x390] sm:$0xff] %v756_v50  ;;  %759 = vst [vmem:[%s3192_s14 + $0x398] sm:$0xff] %v758_v51  ;;  %v762_v53 = vld [vmem:[%s3187_s13 + $0x728] sm:$0xff]  ;;  %v764_v54 = vld [vmem:[%s3187_s13 + $0x730] sm:$0xff] }
  0x4d   : > { %761 = vst [vmem:[%s3192_s14 + $0x3a0] sm:$0xff] %v760_v52  ;;  %v766_v55 = vld [vmem:[%s3187_s13 + $0x738] sm:$0xff]  ;;  %763 = vst [vmem:[%s3192_s14 + $0x3a8] sm:$0xff] %v762_v53  ;;  %v768_v56 = vld [vmem:[%s3187_s13 + $0x740] sm:$0xff] }
  0x4e   : > { %765 = vst [vmem:[%s3192_s14 + $0x3b0] sm:$0xff] %v764_v54  ;;  %767 = vst [vmem:[%s3192_s14 + $0x3b8] sm:$0xff] %v766_v55  ;;  %v770_v57 = vld [vmem:[%s3187_s13 + $0x748] sm:$0xff]  ;;  %v772_v58 = vld [vmem:[%s3187_s13 + $0x750] sm:$0xff] }
  0x4f   : > { %769 = vst [vmem:[%s3192_s14 + $0x3c0] sm:$0xff] %v768_v56  ;;  %771 = vst [vmem:[%s3192_s14 + $0x3c8] sm:$0xff] %v770_v57  ;;  %v774_v59 = vld [vmem:[%s3187_s13 + $0x758] sm:$0xff]  ;;  %v776_v60 = vld [vmem:[%s3187_s13 + $0x760] sm:$0xff] }
  0x50   : > { %773 = vst [vmem:[%s3192_s14 + $0x3d0] sm:$0xff] %v772_v58  ;;  %v778_v61 = vld [vmem:[%s3187_s13 + $0x768] sm:$0xff]  ;;  %775 = vst [vmem:[%s3192_s14 + $0x3d8] sm:$0xff] %v774_v59  ;;  %v780_v62 = vld [vmem:[%s3187_s13 + $0x770] sm:$0xff] }
  0x51   : > { %777 = vst [vmem:[%s3192_s14 + $0x3e0] sm:$0xff] %v776_v60  ;;  %779 = vst [vmem:[%s3192_s14 + $0x3e8] sm:$0xff] %v778_v61  ;;  %v782_v63 = vld [vmem:[%s3187_s13 + $0x778] sm:$0xff] }
  0x52   : > { %781 = vst [vmem:[%s3192_s14 + $0x3f0] sm:$0xff] %v780_v62  ;;  %783 = vst [vmem:[%s3192_s14 + $0x3f8] sm:$0xff] %v782_v63 }
  0x53 PF: > { %789 = sbr.rel (!%p3169_p3) target bundleno = 151 (0x97), region = 70  ;;  %s791_s15 = sand.u32 (%p3169_p3), 1, %s3081_s22  }
  0x54   : > { %s2890_s16 = sshll.u32 (%p3169_p3), %s3089_s24, 7  ;;  %s2875_s17 = sshll.u32 (%p3169_p3), %s791_s15, 10 }
  0x55   : > { %s3454_s20 = scalar_lea.vmem (%p3169_p3), %s4144_s1, %s2890_s16  ;;  %s3459_s28 = scalar_lea.vmem (%p3169_p3), [#allocation4], %s2875_s17 }
  0x56   : > { %v1081_v0 = vld [vmem:[%s3454_s20] sm:$0xff] (%p3169_p3)  ;;  %v1083_v1 = vld [vmem:[%s3454_s20 + $0x8] sm:$0xff] (%p3169_p3)  ;;  %v1085_v2 = vld [vmem:[%s3454_s20 + $0x10] sm:$0xff] (%p3169_p3) }
  0x57   : > { %1082 = vst [vmem:[%s3459_s28] sm:$0xff] (%p3169_p3), %v1081_v0  ;;  %1084 = vst [vmem:[%s3459_s28 + $0x8] sm:$0xff] (%p3169_p3), %v1083_v1  ;;  %v1087_v3 = vld [vmem:[%s3454_s20 + $0x18] sm:$0xff] (%p3169_p3)  ;;  %v1089_v4 = vld [vmem:[%s3454_s20 + $0x20] sm:$0xff] (%p3169_p3) }
  0x58   : > { %1086 = vst [vmem:[%s3459_s28 + $0x10] sm:$0xff] (%p3169_p3), %v1085_v2  ;;  %v1091_v5 = vld [vmem:[%s3454_s20 + $0x28] sm:$0xff] (%p3169_p3)  ;;  %1088 = vst [vmem:[%s3459_s28 + $0x18] sm:$0xff] (%p3169_p3), %v1087_v3  ;;  %v1093_v6 = vld [vmem:[%s3454_s20 + $0x30] sm:$0xff] (%p3169_p3) }
  0x59   : > { %1090 = vst [vmem:[%s3459_s28 + $0x20] sm:$0xff] (%p3169_p3), %v1089_v4  ;;  %1092 = vst [vmem:[%s3459_s28 + $0x28] sm:$0xff] (%p3169_p3), %v1091_v5  ;;  %v1095_v7 = vld [vmem:[%s3454_s20 + $0x38] sm:$0xff] (%p3169_p3)  ;;  %v1097_v8 = vld [vmem:[%s3454_s20 + $0x40] sm:$0xff] (%p3169_p3) }
  0x5a   : > { %1094 = vst [vmem:[%s3459_s28 + $0x30] sm:$0xff] %v1093_v6  ;;  %1096 = vst [vmem:[%s3459_s28 + $0x38] sm:$0xff] %v1095_v7  ;;  %v1099_v9 = vld [vmem:[%s3454_s20 + $0x48] sm:$0xff]  ;;  %v1101_v10 = vld [vmem:[%s3454_s20 + $0x50] sm:$0xff] }
  0x5b   : > { %1098 = vst [vmem:[%s3459_s28 + $0x40] sm:$0xff] %v1097_v8  ;;  %v1103_v11 = vld [vmem:[%s3454_s20 + $0x58] sm:$0xff]  ;;  %1100 = vst [vmem:[%s3459_s28 + $0x48] sm:$0xff] %v1099_v9  ;;  %v1105_v12 = vld [vmem:[%s3454_s20 + $0x60] sm:$0xff] }
  0x5c   : > { %1102 = vst [vmem:[%s3459_s28 + $0x50] sm:$0xff] %v1101_v10  ;;  %1104 = vst [vmem:[%s3459_s28 + $0x58] sm:$0xff] %v1103_v11  ;;  %v1107_v13 = vld [vmem:[%s3454_s20 + $0x68] sm:$0xff]  ;;  %v1109_v14 = vld [vmem:[%s3454_s20 + $0x70] sm:$0xff] }
  0x5d   : > { %1106 = vst [vmem:[%s3459_s28 + $0x60] sm:$0xff] %v1105_v12  ;;  %1108 = vst [vmem:[%s3459_s28 + $0x68] sm:$0xff] %v1107_v13  ;;  %v1111_v15 = vld [vmem:[%s3454_s20 + $0x78] sm:$0xff]  ;;  %v1113_v16 = vld [vmem:[%s3454_s20 + $0x100] sm:$0xff] }
  0x5e   : > { %1110 = vst [vmem:[%s3459_s28 + $0x70] sm:$0xff] %v1109_v14  ;;  %v1115_v17 = vld [vmem:[%s3454_s20 + $0x108] sm:$0xff]  ;;  %1112 = vst [vmem:[%s3459_s28 + $0x78] sm:$0xff] %v1111_v15  ;;  %v1117_v18 = vld [vmem:[%s3454_s20 + $0x110] sm:$0xff] }
  0x5f   : > { %1114 = vst [vmem:[%s3459_s28 + $0x80] sm:$0xff] %v1113_v16  ;;  %1116 = vst [vmem:[%s3459_s28 + $0x88] sm:$0xff] %v1115_v17  ;;  %v1119_v19 = vld [vmem:[%s3454_s20 + $0x118] sm:$0xff]  ;;  %v1121_v20 = vld [vmem:[%s3454_s20 + $0x120] sm:$0xff] }
  0x60   : > { %1118 = vst [vmem:[%s3459_s28 + $0x90] sm:$0xff] %v1117_v18  ;;  %1120 = vst [vmem:[%s3459_s28 + $0x98] sm:$0xff] %v1119_v19  ;;  %v1123_v21 = vld [vmem:[%s3454_s20 + $0x128] sm:$0xff]  ;;  %v1125_v22 = vld [vmem:[%s3454_s20 + $0x130] sm:$0xff] }
  0x61   : > { %1122 = vst [vmem:[%s3459_s28 + $0xa0] sm:$0xff] %v1121_v20  ;;  %v1127_v23 = vld [vmem:[%s3454_s20 + $0x138] sm:$0xff]  ;;  %1124 = vst [vmem:[%s3459_s28 + $0xa8] sm:$0xff] %v1123_v21  ;;  %v1129_v24 = vld [vmem:[%s3454_s20 + $0x140] sm:$0xff] }
  0x62   : > { %1126 = vst [vmem:[%s3459_s28 + $0xb0] sm:$0xff] %v1125_v22  ;;  %1128 = vst [vmem:[%s3459_s28 + $0xb8] sm:$0xff] %v1127_v23  ;;  %v1131_v25 = vld [vmem:[%s3454_s20 + $0x148] sm:$0xff]  ;;  %v1133_v26 = vld [vmem:[%s3454_s20 + $0x150] sm:$0xff] }
  0x63   : > { %1130 = vst [vmem:[%s3459_s28 + $0xc0] sm:$0xff] %v1129_v24  ;;  %1132 = vst [vmem:[%s3459_s28 + $0xc8] sm:$0xff] %v1131_v25  ;;  %v1135_v27 = vld [vmem:[%s3454_s20 + $0x158] sm:$0xff]  ;;  %v1137_v28 = vld [vmem:[%s3454_s20 + $0x160] sm:$0xff] }
  0x64   : > { %1134 = vst [vmem:[%s3459_s28 + $0xd0] sm:$0xff] %v1133_v26  ;;  %v1139_v29 = vld [vmem:[%s3454_s20 + $0x168] sm:$0xff]  ;;  %1136 = vst [vmem:[%s3459_s28 + $0xd8] sm:$0xff] %v1135_v27  ;;  %v1141_v30 = vld [vmem:[%s3454_s20 + $0x170] sm:$0xff] }
  0x65   : > { %1138 = vst [vmem:[%s3459_s28 + $0xe0] sm:$0xff] %v1137_v28  ;;  %1140 = vst [vmem:[%s3459_s28 + $0xe8] sm:$0xff] %v1139_v29  ;;  %v1143_v31 = vld [vmem:[%s3454_s20 + $0x178] sm:$0xff]  ;;  %v1145_v32 = vld [vmem:[%s3454_s20 + $0x200] sm:$0xff] }
  0x66   : > { %1142 = vst [vmem:[%s3459_s28 + $0xf0] sm:$0xff] %v1141_v30  ;;  %1144 = vst [vmem:[%s3459_s28 + $0xf8] sm:$0xff] %v1143_v31  ;;  %v1147_v33 = vld [vmem:[%s3454_s20 + $0x208] sm:$0xff]  ;;  %v1149_v34 = vld [vmem:[%s3454_s20 + $0x210] sm:$0xff] }
  0x67   : > { %1146 = vst [vmem:[%s3459_s28 + $0x100] sm:$0xff] %v1145_v32  ;;  %v1151_v35 = vld [vmem:[%s3454_s20 + $0x218] sm:$0xff]  ;;  %1148 = vst [vmem:[%s3459_s28 + $0x108] sm:$0xff] %v1147_v33  ;;  %v1153_v36 = vld [vmem:[%s3454_s20 + $0x220] sm:$0xff] }
  0x68   : > { %1150 = vst [vmem:[%s3459_s28 + $0x110] sm:$0xff] %v1149_v34  ;;  %1152 = vst [vmem:[%s3459_s28 + $0x118] sm:$0xff] %v1151_v35  ;;  %v1155_v37 = vld [vmem:[%s3454_s20 + $0x228] sm:$0xff]  ;;  %v1157_v38 = vld [vmem:[%s3454_s20 + $0x230] sm:$0xff] }
  0x69   : > { %1154 = vst [vmem:[%s3459_s28 + $0x120] sm:$0xff] %v1153_v36  ;;  %1156 = vst [vmem:[%s3459_s28 + $0x128] sm:$0xff] %v1155_v37  ;;  %v1159_v39 = vld [vmem:[%s3454_s20 + $0x238] sm:$0xff]  ;;  %v1161_v40 = vld [vmem:[%s3454_s20 + $0x240] sm:$0xff] }
  0x6a   : > { %1158 = vst [vmem:[%s3459_s28 + $0x130] sm:$0xff] %v1157_v38  ;;  %v1163_v41 = vld [vmem:[%s3454_s20 + $0x248] sm:$0xff]  ;;  %1160 = vst [vmem:[%s3459_s28 + $0x138] sm:$0xff] %v1159_v39  ;;  %v1165_v42 = vld [vmem:[%s3454_s20 + $0x250] sm:$0xff] }
  0x6b   : > { %1162 = vst [vmem:[%s3459_s28 + $0x140] sm:$0xff] %v1161_v40  ;;  %1164 = vst [vmem:[%s3459_s28 + $0x148] sm:$0xff] %v1163_v41  ;;  %v1167_v43 = vld [vmem:[%s3454_s20 + $0x258] sm:$0xff]  ;;  %v1169_v44 = vld [vmem:[%s3454_s20 + $0x260] sm:$0xff] }
  0x6c   : > { %1166 = vst [vmem:[%s3459_s28 + $0x150] sm:$0xff] %v1165_v42  ;;  %1168 = vst [vmem:[%s3459_s28 + $0x158] sm:$0xff] %v1167_v43  ;;  %v1171_v45 = vld [vmem:[%s3454_s20 + $0x268] sm:$0xff]  ;;  %v1173_v46 = vld [vmem:[%s3454_s20 + $0x270] sm:$0xff] }
  0x6d   : > { %1170 = vst [vmem:[%s3459_s28 + $0x160] sm:$0xff] %v1169_v44  ;;  %v1175_v47 = vld [vmem:[%s3454_s20 + $0x278] sm:$0xff]  ;;  %1172 = vst [vmem:[%s3459_s28 + $0x168] sm:$0xff] %v1171_v45  ;;  %v1177_v48 = vld [vmem:[%s3454_s20 + $0x300] sm:$0xff] }
  0x6e   : > { %1174 = vst [vmem:[%s3459_s28 + $0x170] sm:$0xff] %v1173_v46  ;;  %1176 = vst [vmem:[%s3459_s28 + $0x178] sm:$0xff] %v1175_v47  ;;  %v1179_v49 = vld [vmem:[%s3454_s20 + $0x308] sm:$0xff]  ;;  %v1181_v50 = vld [vmem:[%s3454_s20 + $0x310] sm:$0xff] }
  0x6f   : > { %1178 = vst [vmem:[%s3459_s28 + $0x180] sm:$0xff] %v1177_v48  ;;  %1180 = vst [vmem:[%s3459_s28 + $0x188] sm:$0xff] %v1179_v49  ;;  %v1183_v51 = vld [vmem:[%s3454_s20 + $0x318] sm:$0xff]  ;;  %v1185_v52 = vld [vmem:[%s3454_s20 + $0x320] sm:$0xff] }
  0x70   : > { %1182 = vst [vmem:[%s3459_s28 + $0x190] sm:$0xff] %v1181_v50  ;;  %v1187_v53 = vld [vmem:[%s3454_s20 + $0x328] sm:$0xff]  ;;  %1184 = vst [vmem:[%s3459_s28 + $0x198] sm:$0xff] %v1183_v51  ;;  %v1189_v54 = vld [vmem:[%s3454_s20 + $0x330] sm:$0xff] }
  0x71   : > { %1186 = vst [vmem:[%s3459_s28 + $0x1a0] sm:$0xff] %v1185_v52  ;;  %1188 = vst [vmem:[%s3459_s28 + $0x1a8] sm:$0xff] %v1187_v53  ;;  %v1191_v55 = vld [vmem:[%s3454_s20 + $0x338] sm:$0xff]  ;;  %v1193_v56 = vld [vmem:[%s3454_s20 + $0x340] sm:$0xff] }
  0x72   : > { %1190 = vst [vmem:[%s3459_s28 + $0x1b0] sm:$0xff] %v1189_v54  ;;  %1192 = vst [vmem:[%s3459_s28 + $0x1b8] sm:$0xff] %v1191_v55  ;;  %v1195_v57 = vld [vmem:[%s3454_s20 + $0x348] sm:$0xff]  ;;  %v1197_v58 = vld [vmem:[%s3454_s20 + $0x350] sm:$0xff] }
  0x73   : > { %1194 = vst [vmem:[%s3459_s28 + $0x1c0] sm:$0xff] %v1193_v56  ;;  %v1199_v59 = vld [vmem:[%s3454_s20 + $0x358] sm:$0xff]  ;;  %1196 = vst [vmem:[%s3459_s28 + $0x1c8] sm:$0xff] %v1195_v57  ;;  %v1201_v60 = vld [vmem:[%s3454_s20 + $0x360] sm:$0xff] }
  0x74   : > { %1198 = vst [vmem:[%s3459_s28 + $0x1d0] sm:$0xff] %v1197_v58  ;;  %1200 = vst [vmem:[%s3459_s28 + $0x1d8] sm:$0xff] %v1199_v59  ;;  %v1203_v61 = vld [vmem:[%s3454_s20 + $0x368] sm:$0xff]  ;;  %v1205_v62 = vld [vmem:[%s3454_s20 + $0x370] sm:$0xff] }
  0x75   : > { %1202 = vst [vmem:[%s3459_s28 + $0x1e0] sm:$0xff] %v1201_v60  ;;  %1204 = vst [vmem:[%s3459_s28 + $0x1e8] sm:$0xff] %v1203_v61  ;;  %v1207_v63 = vld [vmem:[%s3454_s20 + $0x378] sm:$0xff]  ;;  %v1209_v0 = vld [vmem:[%s3454_s20 + $0x400] sm:$0xff] }
  0x76   : > { %1206 = vst [vmem:[%s3459_s28 + $0x1f0] sm:$0xff] %v1205_v62  ;;  %v1211_v1 = vld [vmem:[%s3454_s20 + $0x408] sm:$0xff]  ;;  %1208 = vst [vmem:[%s3459_s28 + $0x1f8] sm:$0xff] %v1207_v63  ;;  %v1213_v2 = vld [vmem:[%s3454_s20 + $0x410] sm:$0xff] }
  0x77   : > { %1210 = vst [vmem:[%s3459_s28 + $0x200] sm:$0xff] %v1209_v0  ;;  %1212 = vst [vmem:[%s3459_s28 + $0x208] sm:$0xff] %v1211_v1  ;;  %v1215_v3 = vld [vmem:[%s3454_s20 + $0x418] sm:$0xff]  ;;  %v1217_v4 = vld [vmem:[%s3454_s20 + $0x420] sm:$0xff] }
  0x78   : > { %1214 = vst [vmem:[%s3459_s28 + $0x210] sm:$0xff] %v1213_v2  ;;  %1216 = vst [vmem:[%s3459_s28 + $0x218] sm:$0xff] %v1215_v3  ;;  %v1219_v5 = vld [vmem:[%s3454_s20 + $0x428] sm:$0xff]  ;;  %v1221_v6 = vld [vmem:[%s3454_s20 + $0x430] sm:$0xff] }
  0x79   : > { %1218 = vst [vmem:[%s3459_s28 + $0x220] sm:$0xff] %v1217_v4  ;;  %v1223_v7 = vld [vmem:[%s3454_s20 + $0x438] sm:$0xff]  ;;  %1220 = vst [vmem:[%s3459_s28 + $0x228] sm:$0xff] %v1219_v5  ;;  %v1225_v8 = vld [vmem:[%s3454_s20 + $0x440] sm:$0xff] }
  0x7a   : > { %1222 = vst [vmem:[%s3459_s28 + $0x230] sm:$0xff] %v1221_v6  ;;  %1224 = vst [vmem:[%s3459_s28 + $0x238] sm:$0xff] %v1223_v7  ;;  %v1227_v9 = vld [vmem:[%s3454_s20 + $0x448] sm:$0xff]  ;;  %v1229_v10 = vld [vmem:[%s3454_s20 + $0x450] sm:$0xff] }
  0x7b   : > { %1226 = vst [vmem:[%s3459_s28 + $0x240] sm:$0xff] %v1225_v8  ;;  %1228 = vst [vmem:[%s3459_s28 + $0x248] sm:$0xff] %v1227_v9  ;;  %v1231_v11 = vld [vmem:[%s3454_s20 + $0x458] sm:$0xff]  ;;  %v1233_v12 = vld [vmem:[%s3454_s20 + $0x460] sm:$0xff] }
  0x7c   : > { %1230 = vst [vmem:[%s3459_s28 + $0x250] sm:$0xff] %v1229_v10  ;;  %v1235_v13 = vld [vmem:[%s3454_s20 + $0x468] sm:$0xff]  ;;  %1232 = vst [vmem:[%s3459_s28 + $0x258] sm:$0xff] %v1231_v11  ;;  %v1237_v14 = vld [vmem:[%s3454_s20 + $0x470] sm:$0xff] }
  0x7d   : > { %1234 = vst [vmem:[%s3459_s28 + $0x260] sm:$0xff] %v1233_v12  ;;  %1236 = vst [vmem:[%s3459_s28 + $0x268] sm:$0xff] %v1235_v13  ;;  %v1239_v15 = vld [vmem:[%s3454_s20 + $0x478] sm:$0xff]  ;;  %v1241_v16 = vld [vmem:[%s3454_s20 + $0x500] sm:$0xff] }
  0x7e   : > { %1238 = vst [vmem:[%s3459_s28 + $0x270] sm:$0xff] %v1237_v14  ;;  %1240 = vst [vmem:[%s3459_s28 + $0x278] sm:$0xff] %v1239_v15  ;;  %v1243_v17 = vld [vmem:[%s3454_s20 + $0x508] sm:$0xff]  ;;  %v1245_v18 = vld [vmem:[%s3454_s20 + $0x510] sm:$0xff] }
  0x7f   : > { %1242 = vst [vmem:[%s3459_s28 + $0x280] sm:$0xff] %v1241_v16  ;;  %v1247_v19 = vld [vmem:[%s3454_s20 + $0x518] sm:$0xff]  ;;  %1244 = vst [vmem:[%s3459_s28 + $0x288] sm:$0xff] %v1243_v17  ;;  %v1249_v20 = vld [vmem:[%s3454_s20 + $0x520] sm:$0xff] }
  0x80   : > { %1246 = vst [vmem:[%s3459_s28 + $0x290] sm:$0xff] %v1245_v18  ;;  %1248 = vst [vmem:[%s3459_s28 + $0x298] sm:$0xff] %v1247_v19  ;;  %v1251_v21 = vld [vmem:[%s3454_s20 + $0x528] sm:$0xff]  ;;  %v1253_v22 = vld [vmem:[%s3454_s20 + $0x530] sm:$0xff] }
  0x81   : > { %1250 = vst [vmem:[%s3459_s28 + $0x2a0] sm:$0xff] %v1249_v20  ;;  %1252 = vst [vmem:[%s3459_s28 + $0x2a8] sm:$0xff] %v1251_v21  ;;  %v1255_v23 = vld [vmem:[%s3454_s20 + $0x538] sm:$0xff]  ;;  %v1257_v24 = vld [vmem:[%s3454_s20 + $0x540] sm:$0xff] }
  0x82   : > { %1254 = vst [vmem:[%s3459_s28 + $0x2b0] sm:$0xff] %v1253_v22  ;;  %v1259_v25 = vld [vmem:[%s3454_s20 + $0x548] sm:$0xff]  ;;  %1256 = vst [vmem:[%s3459_s28 + $0x2b8] sm:$0xff] %v1255_v23  ;;  %v1261_v26 = vld [vmem:[%s3454_s20 + $0x550] sm:$0xff] }
  0x83   : > { %1258 = vst [vmem:[%s3459_s28 + $0x2c0] sm:$0xff] %v1257_v24  ;;  %1260 = vst [vmem:[%s3459_s28 + $0x2c8] sm:$0xff] %v1259_v25  ;;  %v1263_v27 = vld [vmem:[%s3454_s20 + $0x558] sm:$0xff]  ;;  %v1265_v28 = vld [vmem:[%s3454_s20 + $0x560] sm:$0xff] }
  0x84   : > { %1262 = vst [vmem:[%s3459_s28 + $0x2d0] sm:$0xff] %v1261_v26  ;;  %1264 = vst [vmem:[%s3459_s28 + $0x2d8] sm:$0xff] %v1263_v27  ;;  %v1267_v29 = vld [vmem:[%s3454_s20 + $0x568] sm:$0xff]  ;;  %v1269_v30 = vld [vmem:[%s3454_s20 + $0x570] sm:$0xff] }
  0x85   : > { %1266 = vst [vmem:[%s3459_s28 + $0x2e0] sm:$0xff] %v1265_v28  ;;  %v1271_v31 = vld [vmem:[%s3454_s20 + $0x578] sm:$0xff]  ;;  %1268 = vst [vmem:[%s3459_s28 + $0x2e8] sm:$0xff] %v1267_v29  ;;  %v1273_v32 = vld [vmem:[%s3454_s20 + $0x600] sm:$0xff] }
  0x86   : > { %1270 = vst [vmem:[%s3459_s28 + $0x2f0] sm:$0xff] %v1269_v30  ;;  %1272 = vst [vmem:[%s3459_s28 + $0x2f8] sm:$0xff] %v1271_v31  ;;  %v1275_v33 = vld [vmem:[%s3454_s20 + $0x608] sm:$0xff]  ;;  %v1277_v34 = vld [vmem:[%s3454_s20 + $0x610] sm:$0xff] }
  0x87   : > { %1274 = vst [vmem:[%s3459_s28 + $0x300] sm:$0xff] %v1273_v32  ;;  %1276 = vst [vmem:[%s3459_s28 + $0x308] sm:$0xff] %v1275_v33  ;;  %v1279_v35 = vld [vmem:[%s3454_s20 + $0x618] sm:$0xff]  ;;  %v1281_v36 = vld [vmem:[%s3454_s20 + $0x620] sm:$0xff] }
  0x88   : > { %1278 = vst [vmem:[%s3459_s28 + $0x310] sm:$0xff] %v1277_v34  ;;  %v1283_v37 = vld [vmem:[%s3454_s20 + $0x628] sm:$0xff]  ;;  %1280 = vst [vmem:[%s3459_s28 + $0x318] sm:$0xff] %v1279_v35  ;;  %v1285_v38 = vld [vmem:[%s3454_s20 + $0x630] sm:$0xff] }
  0x89   : > { %1282 = vst [vmem:[%s3459_s28 + $0x320] sm:$0xff] %v1281_v36  ;;  %1284 = vst [vmem:[%s3459_s28 + $0x328] sm:$0xff] %v1283_v37  ;;  %v1287_v39 = vld [vmem:[%s3454_s20 + $0x638] sm:$0xff]  ;;  %v1289_v40 = vld [vmem:[%s3454_s20 + $0x640] sm:$0xff] }
  0x8a   : > { %1286 = vst [vmem:[%s3459_s28 + $0x330] sm:$0xff] %v1285_v38  ;;  %1288 = vst [vmem:[%s3459_s28 + $0x338] sm:$0xff] %v1287_v39  ;;  %v1291_v41 = vld [vmem:[%s3454_s20 + $0x648] sm:$0xff]  ;;  %v1293_v42 = vld [vmem:[%s3454_s20 + $0x650] sm:$0xff] }
  0x8b   : > { %1290 = vst [vmem:[%s3459_s28 + $0x340] sm:$0xff] %v1289_v40  ;;  %v1295_v43 = vld [vmem:[%s3454_s20 + $0x658] sm:$0xff]  ;;  %1292 = vst [vmem:[%s3459_s28 + $0x348] sm:$0xff] %v1291_v41  ;;  %v1297_v44 = vld [vmem:[%s3454_s20 + $0x660] sm:$0xff] }
  0x8c   : > { %1294 = vst [vmem:[%s3459_s28 + $0x350] sm:$0xff] %v1293_v42  ;;  %1296 = vst [vmem:[%s3459_s28 + $0x358] sm:$0xff] %v1295_v43  ;;  %v1299_v45 = vld [vmem:[%s3454_s20 + $0x668] sm:$0xff]  ;;  %v1301_v46 = vld [vmem:[%s3454_s20 + $0x670] sm:$0xff] }
  0x8d   : > { %1298 = vst [vmem:[%s3459_s28 + $0x360] sm:$0xff] %v1297_v44  ;;  %1300 = vst [vmem:[%s3459_s28 + $0x368] sm:$0xff] %v1299_v45  ;;  %v1303_v47 = vld [vmem:[%s3454_s20 + $0x678] sm:$0xff]  ;;  %v1305_v48 = vld [vmem:[%s3454_s20 + $0x700] sm:$0xff] }
  0x8e   : > { %1302 = vst [vmem:[%s3459_s28 + $0x370] sm:$0xff] %v1301_v46  ;;  %v1307_v49 = vld [vmem:[%s3454_s20 + $0x708] sm:$0xff]  ;;  %1304 = vst [vmem:[%s3459_s28 + $0x378] sm:$0xff] %v1303_v47  ;;  %v1309_v50 = vld [vmem:[%s3454_s20 + $0x710] sm:$0xff] }
  0x8f   : > { %1306 = vst [vmem:[%s3459_s28 + $0x380] sm:$0xff] %v1305_v48  ;;  %1308 = vst [vmem:[%s3459_s28 + $0x388] sm:$0xff] %v1307_v49  ;;  %v1311_v51 = vld [vmem:[%s3454_s20 + $0x718] sm:$0xff]  ;;  %v1313_v52 = vld [vmem:[%s3454_s20 + $0x720] sm:$0xff] }
  0x90   : > { %1310 = vst [vmem:[%s3459_s28 + $0x390] sm:$0xff] %v1309_v50  ;;  %1312 = vst [vmem:[%s3459_s28 + $0x398] sm:$0xff] %v1311_v51  ;;  %v1315_v53 = vld [vmem:[%s3454_s20 + $0x728] sm:$0xff]  ;;  %v1317_v54 = vld [vmem:[%s3454_s20 + $0x730] sm:$0xff] }
  0x91   : > { %1314 = vst [vmem:[%s3459_s28 + $0x3a0] sm:$0xff] %v1313_v52  ;;  %v1319_v55 = vld [vmem:[%s3454_s20 + $0x738] sm:$0xff]  ;;  %1316 = vst [vmem:[%s3459_s28 + $0x3a8] sm:$0xff] %v1315_v53  ;;  %v1321_v56 = vld [vmem:[%s3454_s20 + $0x740] sm:$0xff] }
  0x92   : > { %1318 = vst [vmem:[%s3459_s28 + $0x3b0] sm:$0xff] %v1317_v54  ;;  %1320 = vst [vmem:[%s3459_s28 + $0x3b8] sm:$0xff] %v1319_v55  ;;  %v1323_v57 = vld [vmem:[%s3454_s20 + $0x748] sm:$0xff]  ;;  %v1325_v58 = vld [vmem:[%s3454_s20 + $0x750] sm:$0xff] }
  0x93   : > { %1322 = vst [vmem:[%s3459_s28 + $0x3c0] sm:$0xff] %v1321_v56  ;;  %1324 = vst [vmem:[%s3459_s28 + $0x3c8] sm:$0xff] %v1323_v57  ;;  %v1327_v59 = vld [vmem:[%s3454_s20 + $0x758] sm:$0xff]  ;;  %v1329_v60 = vld [vmem:[%s3454_s20 + $0x760] sm:$0xff] }
  0x94   : > { %1326 = vst [vmem:[%s3459_s28 + $0x3d0] sm:$0xff] %v1325_v58  ;;  %v1331_v61 = vld [vmem:[%s3454_s20 + $0x768] sm:$0xff]  ;;  %1328 = vst [vmem:[%s3459_s28 + $0x3d8] sm:$0xff] %v1327_v59  ;;  %v1333_v62 = vld [vmem:[%s3454_s20 + $0x770] sm:$0xff] }
  0x95   : > { %1330 = vst [vmem:[%s3459_s28 + $0x3e0] sm:$0xff] %v1329_v60  ;;  %1332 = vst [vmem:[%s3459_s28 + $0x3e8] sm:$0xff] %v1331_v61  ;;  %v1335_v63 = vld [vmem:[%s3454_s20 + $0x778] sm:$0xff] }
  0x96   : > { %1334 = vst [vmem:[%s3459_s28 + $0x3f0] sm:$0xff] %v1333_v62  ;;  %1336 = vst [vmem:[%s3459_s28 + $0x3f8] sm:$0xff] %v1335_v63 }
  0x97 PF: > { %p2878_p6 = scmp.ge.s32.totalorder %s3093_s25, 1  ;;  %p1341_p7 = scmp.lt.s32.totalorder %s3093_s25, 3 }
  0x99   : > { %p1342_p8 = pnand %p2878_p6, %p1341_p7 }
  0x9a   : > { %s1348_s29 = sand.u32 (!%p1342_p8), 1, %s3077_s21   ;;  %p2881_p9 = scmp.ne.s32.totalorder (!%p1342_p8), %s3085_s23, 0 }
  0x9b   : > { %1345 = sbr.rel (%p1342_p8) target bundleno = 922 (0x39a), region = 108  ;;  %s2879_s30 = sshll.u32 (!%p1342_p8), %s1348_s29, 10 }
  0x9c   : > { %s3717_s8 = scalar_lea.vmem (!%p1342_p8), [#allocation3], %s2879_s30  ;;  %s3719_s9 = scalar_lea.vmem (!%p1342_p8), [#allocation4], %s2879_s30 }
  0xa2   : > { %1406 = sbr.rel (%p2881_p9) target bundleno = 169 (0xa9), region = 120  ;;  %v3095_v0 = vmov (!%p2881_p9), 0.0  }
  0xa3   : > { %1407 = vst [vmem:[#allocation2] sm:$0xff] (!%p2881_p9), %v3095_v0 }
  0xa9 PF: > { %v1539_v1 = vld [vmem:[%s3719_s9 + $0x10] sm:$0xff]  ;;  %v1537_v2 = vld [vmem:[%s3719_s9] sm:$0xff]  ;;  %v3096_v3 = vmov 0   ;;  %v1540_v4 = vld [vmem:[%s3719_s9 + $0x18] sm:$0xff]  ;;  %vm2609_vm0 = vcmask 1041409   ;;  %vm2611_vm1 = vcmask 1042434  }
  0xaa   : > { %3021 = vset.pattern.permute.xlu1 %v3096_v3  ;;  %3020 = vset.pattern.permute.xlu0 %v3096_v3  ;;  %v1538_v5 = vld [vmem:[%s3719_s9 + $0x8] sm:$0xff]  ;;  %v1541_v7 = vld [vmem:[%s3719_s9 + $0x20] sm:$0xff]  ;;  %v1544_v8 = vld [vmem:[%s3719_s9 + $0x38] sm:$0xff]  ;;  %vm2613_vm2 = vcmask 1043459   ;;  %vm2615_vm3 = vcmask 1044484   ;;  %vm2617_vm4 = vcmask 1045509  }
  0xab   : > { %1677 = vperm.xlu1 %3021, %v1539_v1   ;;  %1667 = vperm.xlu0 %3020, %v1537_v2   ;;  %v1542_v6 = vld [vmem:[%s3719_s9 + $0x28] sm:$0xff]  ;;  %v1543_v9 = vld [vmem:[%s3719_s9 + $0x30] sm:$0xff]  ;;  %v1545_v11 = vld [vmem:[%s3719_s9 + $0x40] sm:$0xff]  ;;  %vm2619_vm5 = vcmask 1046534   ;;  %vm2621_vm6 = vcmask 1047559   ;;  %p2882_p10 = scmp.ne.s32.totalorder %s3085_s23, 1 }
  0xac   : > { %v1546_v10 = vld [vmem:[%s3719_s9 + $0x48] sm:$0xff]  ;;  %v1548_v12 = vld [vmem:[%s3719_s9 + $0x58] sm:$0xff]  ;;  %v1547_v13 = vld [vmem:[%s3719_s9 + $0x50] sm:$0xff]  ;;  %vm3099_vm7 = vmmov (!%p2882_p10), 0   ;;  %vm2734_vm8 = vcmask (!%p2882_p10), 31744  }
  0xad   : > { %v1550_v14 = vld [vmem:[%s3719_s9 + $0x68] sm:$0xff]  ;;  %v1549_v15 = vld [vmem:[%s3719_s9 + $0x60] sm:$0xff]  ;;  %v1552_v16 = vld [vmem:[%s3719_s9 + $0x78] sm:$0xff] }
  0xae   : > { %v1551_v17 = vld [vmem:[%s3719_s9 + $0x70] sm:$0xff]  ;;  %v1554_v18 = vld [vmem:[%s3719_s9 + $0x88] sm:$0xff]  ;;  %v1553_v19 = vld [vmem:[%s3719_s9 + $0x80] sm:$0xff] }
  0xaf   : > { %1682 = vperm.xlu1 %3021, %v1540_v4   ;;  %1672 = vperm.xlu0 %3020, %v1538_v5   ;;  %v1556_v20 = vld [vmem:[%s3719_s9 + $0x98] sm:$0xff]  ;;  %v1555_v21 = vld [vmem:[%s3719_s9 + $0x90] sm:$0xff]  ;;  %v1558_v22 = vld [vmem:[%s3719_s9 + $0xa8] sm:$0xff] }
  0xb0   : > { %v1557_v23 = vld [vmem:[%s3719_s9 + $0xa0] sm:$0xff]  ;;  %v1560_v24 = vld [vmem:[%s3719_s9 + $0xb8] sm:$0xff]  ;;  %v1559_v25 = vld [vmem:[%s3719_s9 + $0xb0] sm:$0xff] }
  0xb1   : > { %v1562_v26 = vld [vmem:[%s3719_s9 + $0xc8] sm:$0xff]  ;;  %v1561_v27 = vld [vmem:[%s3719_s9 + $0xc0] sm:$0xff]  ;;  %v1564_v28 = vld [vmem:[%s3719_s9 + $0xd8] sm:$0xff] }
  0xb2   : > { %v1563_v29 = vld [vmem:[%s3719_s9 + $0xd0] sm:$0xff]  ;;  %v1566_v30 = vld [vmem:[%s3719_s9 + $0xe8] sm:$0xff]  ;;  %v1565_v31 = vld [vmem:[%s3719_s9 + $0xe0] sm:$0xff] }
  0xb3   : > { %1692 = vperm.xlu1 %3021, %v1542_v6   ;;  %1687 = vperm.xlu0 %3020, %v1541_v7   ;;  %v1568_v32 = vld [vmem:[%s3719_s9 + $0xf8] sm:$0xff]  ;;  %v1567_v33 = vld [vmem:[%s3719_s9 + $0xf0] sm:$0xff]  ;;  %v1570_v34 = vld [vmem:[%s3719_s9 + $0x108] sm:$0xff] }
  0xb4   : > { %v1569_v35 = vld [vmem:[%s3719_s9 + $0x100] sm:$0xff]  ;;  %v1572_v36 = vld [vmem:[%s3719_s9 + $0x118] sm:$0xff]  ;;  %v1571_v37 = vld [vmem:[%s3719_s9 + $0x110] sm:$0xff] }
  0xb5   : > { %v1574_v38 = vld [vmem:[%s3719_s9 + $0x128] sm:$0xff]  ;;  %v1573_v39 = vld [vmem:[%s3719_s9 + $0x120] sm:$0xff]  ;;  %v1576_v40 = vld [vmem:[%s3719_s9 + $0x138] sm:$0xff] }
  0xb6   : > { %v1575_v41 = vld [vmem:[%s3719_s9 + $0x130] sm:$0xff]  ;;  %v1578_v42 = vld [vmem:[%s3719_s9 + $0x148] sm:$0xff]  ;;  %v1577_v43 = vld [vmem:[%s3719_s9 + $0x140] sm:$0xff] }
  0xb7   : > { %1702 = vperm.xlu1 %3021, %v1544_v8   ;;  %1697 = vperm.xlu0 %3020, %v1543_v9   ;;  %v1580_v44 = vld [vmem:[%s3719_s9 + $0x158] sm:$0xff]  ;;  %v1579_v45 = vld [vmem:[%s3719_s9 + $0x150] sm:$0xff]  ;;  %v1582_v46 = vld [vmem:[%s3719_s9 + $0x168] sm:$0xff] }
  0xb8   : > { %v1581_v47 = vld [vmem:[%s3719_s9 + $0x160] sm:$0xff]  ;;  %v1584_v48 = vld [vmem:[%s3719_s9 + $0x178] sm:$0xff]  ;;  %v1583_v49 = vld [vmem:[%s3719_s9 + $0x170] sm:$0xff] }
  0xb9   : > { %v1586_v50 = vld [vmem:[%s3719_s9 + $0x188] sm:$0xff]  ;;  %v1585_v51 = vld [vmem:[%s3719_s9 + $0x180] sm:$0xff]  ;;  %v1588_v52 = vld [vmem:[%s3719_s9 + $0x198] sm:$0xff] }
  0xba   : > { %v1587_v53 = vld [vmem:[%s3719_s9 + $0x190] sm:$0xff]  ;;  %v1590_v54 = vld [vmem:[%s3719_s9 + $0x1a8] sm:$0xff]  ;;  %v1589_v55 = vld [vmem:[%s3719_s9 + $0x1a0] sm:$0xff] }
  0xbb   : > { %1712 = vperm.xlu1 %3021, %v1546_v10   ;;  %1707 = vperm.xlu0 %3020, %v1545_v11   ;;  %v1592_v56 = vld [vmem:[%s3719_s9 + $0x1b8] sm:$0xff]  ;;  %v1591_v57 = vld [vmem:[%s3719_s9 + $0x1b0] sm:$0xff]  ;;  %v1594_v58 = vld [vmem:[%s3719_s9 + $0x1c8] sm:$0xff] }
  0xbc   : > { %v1593_v59 = vld [vmem:[%s3719_s9 + $0x1c0] sm:$0xff]  ;;  %v1596_v60 = vld [vmem:[%s3719_s9 + $0x1d8] sm:$0xff]  ;;  %v1595_v61 = vld [vmem:[%s3719_s9 + $0x1d0] sm:$0xff] }
  0xbd   : > { %v1598_v62 = vld [vmem:[%s3719_s9 + $0x1e8] sm:$0xff]  ;;  %v1597_v63 = vld [vmem:[%s3719_s9 + $0x1e0] sm:$0xff]  ;;  %v1600_v0 = vld [vmem:[%s3719_s9 + $0x1f8] sm:$0xff] }
  0xbe   : > { %v1599_v1 = vld [vmem:[%s3719_s9 + $0x1f0] sm:$0xff]  ;;  %v1602_v2 = vld [vmem:[%s3719_s9 + $0x208] sm:$0xff]  ;;  %v1601_v3 = vld [vmem:[%s3719_s9 + $0x200] sm:$0xff] }
  0xbf   : > { %1722 = vperm.xlu1 %3021, %v1548_v12   ;;  %1717 = vperm.xlu0 %3020, %v1547_v13   ;;  %v1604_v6 = vld [vmem:[%s3719_s9 + $0x218] sm:$0xff]  ;;  %v1603_v7 = vld [vmem:[%s3719_s9 + $0x210] sm:$0xff]  ;;  %v1606_v10 = vld [vmem:[%s3719_s9 + $0x228] sm:$0xff] }
  0xc0   : > { %v1605_v11 = vld [vmem:[%s3719_s9 + $0x220] sm:$0xff] }
  0xc3   : > { %1732 = vperm.xlu1 %3021, %v1550_v14   ;;  %1727 = vperm.xlu0 %3020, %v1549_v15   ;;  %v1608_v14 = vld [vmem:[%s3719_s9 + $0x238] sm:$0xff]  ;;  %v1607_v15 = vld [vmem:[%s3719_s9 + $0x230] sm:$0xff] }
  0xc7   : > { %1742 = vperm.xlu1 %3021, %v1552_v16   ;;  %1737 = vperm.xlu0 %3020, %v1551_v17  }
  0xcb   : > { %1752 = vperm.xlu1 %3021, %v1554_v18   ;;  %1747 = vperm.xlu0 %3020, %v1553_v19   ;;  %v1610_v18 = vld [vmem:[%s3719_s9 + $0x248] sm:$0xff]  ;;  %v1609_v19 = vld [vmem:[%s3719_s9 + $0x240] sm:$0xff] }
  0xcf   : > { %1762 = vperm.xlu1 %3021, %v1556_v20   ;;  %1757 = vperm.xlu0 %3020, %v1555_v21  }
  0xd3   : > { %1772 = vperm.xlu1 %3021, %v1558_v22   ;;  %1767 = vperm.xlu0 %3020, %v1557_v23   ;;  %v1612_v22 = vld [vmem:[%s3719_s9 + $0x258] sm:$0xff]  ;;  %v1611_v23 = vld [vmem:[%s3719_s9 + $0x250] sm:$0xff] }
  0xd7   : > { %1782 = vperm.xlu1 %3021, %v1560_v24   ;;  %1777 = vperm.xlu0 %3020, %v1559_v25  }
  0xdb   : > { %1792 = vperm.xlu1 %3021, %v1562_v26   ;;  %1787 = vperm.xlu0 %3020, %v1561_v27   ;;  %v1410_v26 = vld [vmem:[%s3717_s8 + $0x8] sm:$0xff] }
  0xdc   : > { %v1614_v27 = vld [vmem:[%s3719_s9 + $0x268] sm:$0xff] }
  0xdf   : > { %1802 = vperm.xlu1 %3021, %v1564_v28   ;;  %1797 = vperm.xlu0 %3020, %v1563_v29   ;;  %v1613_v28 = vld [vmem:[%s3719_s9 + $0x260] sm:$0xff] }
  0xe0   : > { %v1409_v29 = vld [vmem:[%s3717_s8] sm:$0xff] }
  0xe3   : > { %1812 = vperm.xlu1 %3021, %v1566_v30   ;;  %1807 = vperm.xlu0 %3020, %v1565_v31  }
  0xe7   : > { %1822 = vperm.xlu1 %3021, %v1568_v32   ;;  %1817 = vperm.xlu0 %3020, %v1567_v33  }
  0xeb   : > { %1832 = vperm.xlu1 %3021, %v1570_v34   ;;  %1827 = vperm.xlu0 %3020, %v1569_v35   ;;  %v1616_v34 = vld [vmem:[%s3719_s9 + $0x278] sm:$0xff]  ;;  %v1615_v35 = vld [vmem:[%s3719_s9 + $0x270] sm:$0xff] }
  0xef   : > { %1842 = vperm.xlu1 %3021, %v1572_v36   ;;  %1837 = vperm.xlu0 %3020, %v1571_v37   ;;  %v1411_v36 = vld [vmem:[%s3717_s8 + $0x10] sm:$0xff] }
  0xf3   : > { %1852 = vperm.xlu1 %3021, %v1574_v38   ;;  %1847 = vperm.xlu0 %3020, %v1573_v39  }
  0xf7   : > { %1862 = vperm.xlu1 %3021, %v1576_v40   ;;  %1857 = vperm.xlu0 %3020, %v1575_v41   ;;  %v1426_v40 = vld [vmem:[%s3717_s8 + $0x88] sm:$0xff] }
  0xfb   : > { %1872 = vperm.xlu1 %3021, %v1578_v42   ;;  %1867 = vperm.xlu0 %3020, %v1577_v43   ;;  %v1425_v42 = vld [vmem:[%s3717_s8 + $0x80] sm:$0xff]  ;;  %v1618_v43 = vld [vmem:[%s3719_s9 + $0x288] sm:$0xff] }
  0xff   : > { %1882 = vperm.xlu1 %3021, %v1580_v44   ;;  %1877 = vperm.xlu0 %3020, %v1579_v45   ;;  %v1617_v44 = vld [vmem:[%s3719_s9 + $0x280] sm:$0xff]  ;;  %v1412_v45 = vld [vmem:[%s3717_s8 + $0x18] sm:$0xff] }
 0x103   : > { %1892 = vperm.xlu1 %3021, %v1582_v46   ;;  %1887 = vperm.xlu0 %3020, %v1581_v47  }
 0x107   : > { %1902 = vperm.xlu1 %3021, %v1584_v48   ;;  %1897 = vperm.xlu0 %3020, %v1583_v49  }
 0x10b   : > { %1912 = vperm.xlu1 %3021, %v1586_v50   ;;  %1907 = vperm.xlu0 %3020, %v1585_v51  }
 0x10f   : > { %1922 = vperm.xlu1 %3021, %v1588_v52   ;;  %1917 = vperm.xlu0 %3020, %v1587_v53   ;;  %v1427_v52 = vld [vmem:[%s3717_s8 + $0x90] sm:$0xff]  ;;  %v1620_v53 = vld [vmem:[%s3719_s9 + $0x298] sm:$0xff] }
 0x113   : > { %1932 = vperm.xlu1 %3021, %v1590_v54   ;;  %1927 = vperm.xlu0 %3020, %v1589_v55   ;;  %v1619_v54 = vld [vmem:[%s3719_s9 + $0x290] sm:$0xff]  ;;  %v1413_v55 = vld [vmem:[%s3717_s8 + $0x20] sm:$0xff] }
 0x117   : > { %1942 = vperm.xlu1 %3021, %v1592_v56   ;;  %1937 = vperm.xlu0 %3020, %v1591_v57  }
 0x11b   : > { %1952 = vperm.xlu1 %3021, %v1594_v58   ;;  %1947 = vperm.xlu0 %3020, %v1593_v59   ;;  %v1428_v58 = vld [vmem:[%s3717_s8 + $0x98] sm:$0xff] }
 0x11f   : > { %1962 = vperm.xlu1 %3021, %v1596_v60   ;;  %1957 = vperm.xlu0 %3020, %v1595_v61  }
 0x123   : > { %1972 = vperm.xlu1 %3021, %v1598_v62   ;;  %1967 = vperm.xlu0 %3020, %v1597_v63   ;;  %v1429_v63 = vld [vmem:[%s3717_s8 + $0xa0] sm:$0xff] }
 0x127   : > { %1982 = vperm.xlu1 %3021, %v1600_v0   ;;  %1977 = vperm.xlu0 %3020, %v1599_v1   ;;  %v1622_v0 = vld [vmem:[%s3719_s9 + $0x2a8] sm:$0xff]  ;;  %v1621_v1 = vld [vmem:[%s3719_s9 + $0x2a0] sm:$0xff] }
 0x12a   : > { %v1678_v4 = vpop.permute.xlu1 %1677  ;;  %v1668_v5 = vpop.permute.xlu0 %1667 }
 0x12b   : > { %1992 = vperm.xlu1 %3021, %v1602_v2   ;;  %1987 = vperm.xlu0 %3020, %v1601_v3   ;;  %v2305_v33 = vmul.f32 %v1668_v5, %v1409_v29  ;;  %v2307_v41 = vmul.f32 %v1678_v4, %v1411_v36  ;;  %v1414_v2 = vld [vmem:[%s3717_s8 + $0x28] sm:$0xff]  ;;  %v1416_v36 = vld [vmem:[%s3717_s8 + $0x38] sm:$0xff] }
 0x12e   : > { %v1683_v8 = vpop.permute.xlu1 %1682  ;;  %v1673_v9 = vpop.permute.xlu0 %1672 }
 0x12f   : > { %2002 = vperm.xlu1 %3021, %v1604_v6   ;;  %1997 = vperm.xlu0 %3020, %v1603_v7   ;;  %v2306_v30 = vmul.f32 %v1673_v9, %v1410_v26  ;;  %v2308_v51 = vmul.f32 %v1683_v8, %v1412_v45  ;;  %v1430_v7 = vld [vmem:[%s3717_s8 + $0xa8] sm:$0xff] }
 0x131   : > { %v2433_v37 = vadd.f32 %v2306_v30, %v2305_v33  ;;  %v1433_v33 = vld [vmem:[%s3717_s8 + $0xc0] sm:$0xff] }
 0x132   : > { %v3792_v12 = vpop.permute.xlu1 %1692  ;;  %v3794_v13 = vpop.permute.xlu0 %1687 }
 0x133   : > { %2012 = vperm.xlu1 %3021, %v1606_v10   ;;  %2007 = vperm.xlu0 %3020, %v1605_v11   ;;  %v2434_v46 = vadd.f32 %v2433_v37, %v2307_v41  ;;  %v2309_v62 = vmul.f32 %v3794_v13, %v1413_v55  ;;  %v2310_v11 = vmul.f32 %v3792_v12, %v1414_v2  ;;  %v1431_v13 = vld [vmem:[%s3717_s8 + $0xb0] sm:$0xff]  ;;  %v1436_v55 = vld [vmem:[%s3717_s8 + $0xd8] sm:$0xff] }
 0x135   : > { %v2435_v56 = vadd.f32 %v2434_v46, %v2308_v51 }
 0x136   : > { %v3798_v16 = vpop.permute.xlu1 %1702  ;;  %v3800_v17 = vpop.permute.xlu0 %1697 }
 0x137   : > { %2022 = vperm.xlu1 %3021, %v1608_v14   ;;  %2017 = vperm.xlu0 %3020, %v1607_v15   ;;  %v2436_v5 = vadd.f32 %v2435_v56, %v2309_v62  ;;  %v1624_v14 = vld [vmem:[%s3719_s9 + $0x2b8] sm:$0xff]  ;;  %v1623_v15 = vld [vmem:[%s3719_s9 + $0x2b0] sm:$0xff]  ;;  %v1418_v62 = vld [vmem:[%s3717_s8 + $0x48] sm:$0xff] }
 0x13a   : > { %v3804_v20 = vpop.permute.xlu1 %1712  ;;  %v3806_v21 = vpop.permute.xlu0 %1707 }
 0x13b   : > { %2032 = vperm.xlu1 %3021, %v1610_v18   ;;  %2027 = vperm.xlu0 %3020, %v1609_v19   ;;  %v1415_v18 = vld [vmem:[%s3717_s8 + $0x30] sm:$0xff] }
 0x13c   : > { %v2311_v12 = vmul.f32 %v3800_v17, %v1415_v18  ;;  %v2312_v17 = vmul.f32 %v3798_v16, %v1416_v36  ;;  %v1440_v18 = vld [vmem:[%s3717_s8 + $0xf8] sm:$0xff] }
 0x13e   : > { %v3810_v24 = vpop.permute.xlu1 %1722  ;;  %v3812_v25 = vpop.permute.xlu0 %1717 }
 0x13f   : > { %2042 = vperm.xlu1 %3021, %v1612_v22   ;;  %2037 = vperm.xlu0 %3020, %v1611_v23   ;;  %v2437_v23 = vadd.f32 %v2436_v5, %v2310_v11 }
 0x141   : > { %v2438_v41 = vadd.f32 %v2437_v23, %v2311_v12 }
 0x142   : > { %v3818_v31 = vpop.permute.xlu1 %1732  ;;  %v3820_v32 = vpop.permute.xlu0 %1727 }
 0x143   : > { %2052 = vperm.xlu1 %3021, %v1614_v27   ;;  %2047 = vperm.xlu0 %3020, %v1613_v28   ;;  %v1432_v27 = vld [vmem:[%s3717_s8 + $0xb8] sm:$0xff] }
 0x146   : > { %v3825_v38 = vpop.permute.xlu1 %1742  ;;  %v3827_v39 = vpop.permute.xlu0 %1737 }
 0x147   : > { %2062 = vperm.xlu1 %3021, %v1616_v34   ;;  %2057 = vperm.xlu0 %3020, %v1615_v35   ;;  %v1626_v34 = vld [vmem:[%s3719_s9 + $0x2c8] sm:$0xff]  ;;  %v1625_v35 = vld [vmem:[%s3719_s9 + $0x2c0] sm:$0xff] }
 0x14a   : > { %v1753_v47 = vpop.permute.xlu1 %1752  ;;  %v1748_v48 = vpop.permute.xlu0 %1747 }
 0x14b   : > { %v2322_v49 = vmul.f32 %v1753_v47, %v1426_v40  ;;  %v2321_v50 = vmul.f32 %v1748_v48, %v1425_v42  ;;  %2072 = vperm.xlu1 %3021, %v1618_v43   ;;  %2067 = vperm.xlu0 %3020, %v1617_v44   ;;  %v1434_v43 = vld [vmem:[%s3717_s8 + $0xc8] sm:$0xff]  ;;  %v1435_v47 = vld [vmem:[%s3717_s8 + $0xd0] sm:$0xff]  ;;  %v1628_v48 = vld [vmem:[%s3719_s9 + $0x2d8] sm:$0xff] }
 0x14d   : > { %v2454_v60 = vadd.f32 %v2322_v49, %v2321_v50  ;;  %v1627_v49 = vld [vmem:[%s3719_s9 + $0x2d0] sm:$0xff]  ;;  %v1417_v50 = vld [vmem:[%s3717_s8 + $0x40] sm:$0xff] }
 0x14e   : > { %v1763_v57 = vpop.permute.xlu1 %1762  ;;  %v1758_v59 = vpop.permute.xlu0 %1757  ;;  %v2313_v16 = vmul.f32 %v3806_v21, %v1417_v50  ;;  %v2314_v21 = vmul.f32 %v3804_v20, %v1418_v62  ;;  %v1447_v62 = vld [vmem:[%s3717_s8 + $0x130] sm:$0xff] }
 0x14f   : > { %v2323_v61 = vmul.f32 %v1758_v59, %v1427_v52  ;;  %2082 = vperm.xlu1 %3021, %v1620_v53   ;;  %2077 = vperm.xlu0 %3020, %v1619_v54   ;;  %v2324_v3 = vmul.f32 %v1763_v57, %v1428_v58  ;;  %v2439_v53 = vadd.f32 %v2438_v41, %v2312_v17  ;;  %v1437_v59 = vld [vmem:[%s3717_s8 + $0xe0] sm:$0xff] }
 0x151   : > { %v2455_v4 = vadd.f32 %v2454_v60, %v2323_v61  ;;  %v1630_v60 = vld [vmem:[%s3719_s9 + $0x2e8] sm:$0xff]  ;;  %v1629_v61 = vld [vmem:[%s3719_s9 + $0x2e0] sm:$0xff] }
 0x152   : > { %v1773_v6 = vpop.permute.xlu1 %1772  ;;  %v1768_v8 = vpop.permute.xlu0 %1767 }
 0x153   : > { %v2325_v9 = vmul.f32 %v1768_v8, %v1429_v63  ;;  %v2456_v10 = vadd.f32 %v2455_v4, %v2324_v3  ;;  %2092 = vperm.xlu1 %3021, %v1622_v0   ;;  %2087 = vperm.xlu0 %3020, %v1621_v1   ;;  %v2326_v19 = vmul.f32 %v1773_v6, %v1430_v7  ;;  %v1438_v3 = vld [vmem:[%s3717_s8 + $0xe8] sm:$0xff]  ;;  %v1439_v7 = vld [vmem:[%s3717_s8 + $0xf0] sm:$0xff]  ;;  %v1632_v8 = vld [vmem:[%s3719_s9 + $0x2f8] sm:$0xff] }
 0x154   : > { %v2440_v1 = vadd.f32 %v2439_v53, %v2313_v16  ;;  %v1422_v53 = vld [vmem:[%s3717_s8 + $0x68] sm:$0xff] }
 0x155   : > { %v2457_v22 = vadd.f32 %v2456_v10, %v2325_v9  ;;  %v1631_v9 = vld [vmem:[%s3719_s9 + $0x2f0] sm:$0xff]  ;;  %v1446_v16 = vld [vmem:[%s3717_s8 + $0x128] sm:$0xff] }
 0x156   : > { %v1783_v26 = vpop.permute.xlu1 %1782  ;;  %v1778_v28 = vpop.permute.xlu0 %1777  ;;  %v1419_v10 = vld [vmem:[%s3717_s8 + $0x50] sm:$0xff] }
 0x157   : > { %v2327_v29 = vmul.f32 %v1778_v28, %v1431_v13  ;;  %v2458_v30 = vadd.f32 %v2457_v22, %v2326_v19  ;;  %2102 = vperm.xlu1 %3021, %v1624_v14   ;;  %2097 = vperm.xlu0 %3020, %v1623_v15   ;;  %v2328_v37 = vmul.f32 %v1783_v26, %v1432_v27  ;;  %v1442_v26 = vld [vmem:[%s3717_s8 + $0x108] sm:$0xff]  ;;  %v1441_v27 = vld [vmem:[%s3717_s8 + $0x100] sm:$0xff] }
 0x158   : > { %v2441_v14 = vadd.f32 %v2440_v1, %v2314_v21  ;;  %v2315_v20 = vmul.f32 %v3812_v25, %v1419_v10  ;;  %v1634_v28 = vld [vmem:[%s3719_s9 + $0x308] sm:$0xff]  ;;  %v1653_v10 = vld [vmem:[%s3719_s9 + $0x3a0] sm:$0xff] }
 0x159   : > { %v2459_v40 = vadd.f32 %v2458_v30, %v2327_v29  ;;  %v1633_v29 = vld [vmem:[%s3719_s9 + $0x300] sm:$0xff]  ;;  %v1420_v30 = vld [vmem:[%s3717_s8 + $0x58] sm:$0xff] }
 0x15a   : > { %v1793_v42 = vpop.permute.xlu1 %1792  ;;  %v1788_v44 = vpop.permute.xlu0 %1787  ;;  %v2316_v25 = vmul.f32 %v3810_v24, %v1420_v30  ;;  %v1650_v24 = vld [vmem:[%s3719_s9 + $0x388] sm:$0xff] }
 0x15b   : > { %v2329_v45 = vmul.f32 %v1788_v44, %v1433_v33  ;;  %v2460_v46 = vadd.f32 %v2459_v40, %v2328_v37  ;;  %2112 = vperm.xlu1 %3021, %v1626_v34   ;;  %2107 = vperm.xlu0 %3020, %v1625_v35   ;;  %v2330_v51 = vmul.f32 %v1793_v42, %v1434_v43  ;;  %v1443_v42 = vld [vmem:[%s3717_s8 + $0x110] sm:$0xff]  ;;  %v1636_v43 = vld [vmem:[%s3719_s9 + $0x318] sm:$0xff] }
 0x15c   : > { %v2442_v34 = vadd.f32 %v2441_v14, %v2315_v20  ;;  %v1635_v44 = vld [vmem:[%s3719_s9 + $0x310] sm:$0xff] }
 0x15d   : > { %v2461_v52 = vadd.f32 %v2460_v46, %v2329_v45  ;;  %v1421_v45 = vld [vmem:[%s3717_s8 + $0x60] sm:$0xff] }
 0x15e   : > { %v1803_v54 = vpop.permute.xlu1 %1802  ;;  %v1798_v56 = vpop.permute.xlu0 %1797  ;;  %v2443_v17 = vadd.f32 %v2442_v34, %v2316_v25 }
 0x15f   : > { %v2331_v57 = vmul.f32 %v1798_v56, %v1435_v47  ;;  %v2462_v58 = vadd.f32 %v2461_v52, %v2330_v51  ;;  %2122 = vperm.xlu1 %3021, %v1628_v48   ;;  %2117 = vperm.xlu0 %3020, %v1627_v49   ;;  %v2332_v63 = vmul.f32 %v1803_v54, %v1436_v55  ;;  %v1444_v48 = vld [vmem:[%s3717_s8 + $0x118] sm:$0xff]  ;;  %v1445_v52 = vld [vmem:[%s3717_s8 + $0x120] sm:$0xff] }
 0x160   : > { %v2317_v51 = vmul.f32 %v3820_v32, %v1421_v45  ;;  %v1649_v56 = vld [vmem:[%s3719_s9 + $0x380] sm:$0xff]  ;;  %v2318_v32 = vmul.f32 %v3818_v31, %v1422_v53  ;;  %v1639_v45 = vld [vmem:[%s3719_s9 + $0x330] sm:$0xff] }
 0x161   : > { %v2463_v0 = vadd.f32 %v2462_v58, %v2331_v57 }
 0x162   : > { %v1813_v2 = vpop.permute.xlu1 %1812  ;;  %v1808_v4 = vpop.permute.xlu0 %1807  ;;  %v2444_v57 = vadd.f32 %v2443_v17, %v2317_v51 }
 0x163   : > { %v2333_v5 = vmul.f32 %v1808_v4, %v1437_v59  ;;  %v2464_v6 = vadd.f32 %v2463_v0, %v2332_v63  ;;  %2132 = vperm.xlu1 %3021, %v1630_v60   ;;  %2127 = vperm.xlu0 %3020, %v1629_v61   ;;  %v2334_v11 = vmul.f32 %v1813_v2, %v1438_v3  ;;  %v1652_v63 = vld [vmem:[%s3719_s9 + $0x398] sm:$0xff]  ;;  %v1423_v0 = vld [vmem:[%s3717_s8 + $0x70] sm:$0xff] }
 0x164   : > { %v1651_v3 = vld [vmem:[%s3719_s9 + $0x390] sm:$0xff]  ;;  %v2445_v4 = vadd.f32 %v2444_v57, %v2318_v32  ;;  %v2319_v31 = vmul.f32 %v3827_v39, %v1423_v0  ;;  %v1457_v32 = vld [vmem:[%s3717_s8 + $0x180] sm:$0xff] }
 0x165   : > { %v2465_v13 = vadd.f32 %v2464_v6, %v2333_v5  ;;  %v1448_v6 = vld [vmem:[%s3717_s8 + $0x138] sm:$0xff] }
 0x166   : > { %v1823_v15 = vpop.permute.xlu1 %1822  ;;  %v1818_v19 = vpop.permute.xlu0 %1817 }
 0x167   : > { %v2335_v22 = vmul.f32 %v1818_v19, %v1439_v7  ;;  %v2466_v23 = vadd.f32 %v2465_v13, %v2334_v11  ;;  %2142 = vperm.xlu1 %3021, %v1632_v8   ;;  %2137 = vperm.xlu0 %3020, %v1631_v9   ;;  %v2336_v12 = vmul.f32 %v1823_v15, %v1440_v18  ;;  %v1449_v9 = vld [vmem:[%s3717_s8 + $0x140] sm:$0xff]  ;;  %v1424_v11 = vld [vmem:[%s3717_s8 + $0x78] sm:$0xff] }
 0x168   : > { %v1637_v15 = vld [vmem:[%s3719_s9 + $0x320] sm:$0xff]  ;;  %v2446_v18 = vadd.f32 %v2445_v4, %v2319_v31  ;;  %v2320_v39 = vmul.f32 %v3825_v38, %v1424_v11  ;;  %v1658_v31 = vld [vmem:[%s3719_s9 + $0x3c8] sm:$0xff] }
 0x169   : > { %v2467_v33 = vadd.f32 %v2466_v23, %v2335_v22  ;;  %v1450_v22 = vld [vmem:[%s3717_s8 + $0x148] sm:$0xff]  ;;  %v1453_v38 = vld [vmem:[%s3717_s8 + $0x160] sm:$0xff] }
 0x16a   : > { %v1833_v35 = vpop.permute.xlu1 %1832  ;;  %v1828_v36 = vpop.permute.xlu0 %1827  ;;  %v1642_v11 = vld [vmem:[%s3719_s9 + $0x348] sm:$0xff] }
 0x16b   : > { %v3881_v37 = vadd.f32 %v2467_v33, %v2336_v12  ;;  %v2338_v40 = vmul.f32 %v1833_v35, %v1442_v26  ;;  %v2337_v41 = vmul.f32 %v1828_v36, %v1441_v27  ;;  %2152 = vperm.xlu1 %3021, %v1634_v28   ;;  %2147 = vperm.xlu0 %3020, %v1633_v29   ;;  %v1451_v27 = vld [vmem:[%s3717_s8 + $0x150] sm:$0xff]  ;;  %v1654_v28 = vld [vmem:[%s3719_s9 + $0x3a8] sm:$0xff]  ;;  %v1452_v35 = vld [vmem:[%s3717_s8 + $0x158] sm:$0xff] }
 0x16c   : > { %v1638_v12 = vld [vmem:[%s3719_s9 + $0x328] sm:$0xff]  ;;  %v2447_v33 = vadd.f32 %v2446_v18, %v2320_v39 }
 0x16d   : > { %v2475_v46 = vadd.f32 %v2338_v40, %v2337_v41  ;;  %v2469_v25 = vrot.slane %v3881_v37, 4 }
 0x16e   : > { %v1843_v47 = vpop.permute.xlu1 %1842  ;;  %v1838_v49 = vpop.permute.xlu0 %1837 }
 0x16f   : > { %v2339_v50 = vmul.f32 %v1838_v49, %v1443_v42  ;;  %2162 = vperm.xlu1 %3021, %v1636_v43   ;;  %2157 = vperm.xlu0 %3020, %v1635_v44   ;;  %v2340_v54 = vmul.f32 %v1843_v47, %v1444_v48  ;;  %v1655_v42 = vld [vmem:[%s3719_s9 + $0x3b0] sm:$0xff]  ;;  %v1454_v47 = vld [vmem:[%s3717_s8 + $0x168] sm:$0xff]  ;;  %v2470_v51 = vadd.f32 %v2469_v25, %v3881_v37 }
 0x170   : > { %v1458_v37 = vld [vmem:[%s3717_s8 + $0x188] sm:$0xff]  ;;  %v1463_v25 = vld [vmem:[%s3717_s8 + $0x1b0] sm:$0xff] }
 0x171   : > { %v2476_v55 = vadd.f32 %v2475_v46, %v2339_v50  ;;  %v2448_v46 = vrot.slane %v2447_v33, 4 }
 0x172   : > { %v1853_v58 = vpop.permute.xlu1 %1852  ;;  %v1848_v59 = vpop.permute.xlu0 %1847 }
 0x173   : > { %v2341_v60 = vmul.f32 %v1848_v59, %v1445_v52  ;;  %v2477_v61 = vadd.f32 %v2476_v55, %v2340_v54  ;;  %2232 = vperm.xlu1 %3021, %v1650_v24   ;;  %2227 = vperm.xlu0 %3020, %v1649_v56   ;;  %v2342_v1 = vmul.f32 %v1853_v58, %v1446_v16  ;;  %v1455_v52 = vld [vmem:[%s3717_s8 + $0x170] sm:$0xff]  ;;  %v1656_v24 = vld [vmem:[%s3719_s9 + $0x3b8] sm:$0xff] }
 0x174   : > { %v1640_v55 = vld [vmem:[%s3719_s9 + $0x338] sm:$0xff]  ;;  %v2449_v56 = vadd.f32 %v2448_v46, %v2447_v33  ;;  %v1462_v33 = vld [vmem:[%s3717_s8 + $0x1a8] sm:$0xff] }
 0x175   : > { %v2478_v2 = vadd.f32 %v2477_v61, %v2341_v60  ;;  %v1456_v58 = vld [vmem:[%s3717_s8 + $0x178] sm:$0xff]  ;;  %v2471_v61 = vrot.slane %v2470_v51, 2 }
 0x176   : > { %v1863_v5 = vpop.permute.xlu1 %1862  ;;  %v1858_v21 = vpop.permute.xlu0 %1857 }
 0x177   : > { %v2343_v7 = vmul.f32 %v1858_v21, %v1447_v62  ;;  %v2479_v8 = vadd.f32 %v2478_v2, %v2342_v1  ;;  %2242 = vperm.xlu1 %3021, %v1652_v63   ;;  %2237 = vperm.xlu0 %3020, %v1651_v3   ;;  %v2344_v13 = vmul.f32 %v1863_v5, %v1448_v6  ;;  %v1657_v62 = vld [vmem:[%s3719_s9 + $0x3c0] sm:$0xff]  ;;  %v2450_v2 = vrot.slane %v2449_v56, 2 }
 0x178   : > { %v1641_v1 = vld [vmem:[%s3719_s9 + $0x340] sm:$0xff] }
 0x179   : > { %v2480_v14 = vadd.f32 %v2479_v8, %v2343_v7  ;;  %v2472_v7 = vadd.f32 %v2471_v61, %v2470_v51  ;;  %v1459_v8 = vld [vmem:[%s3717_s8 + $0x190] sm:$0xff] }
 0x17a   : > { %v1873_v19 = vpop.permute.xlu1 %1872  ;;  %v1868_v23 = vpop.permute.xlu0 %1867 }
 0x17b   : > { %v2345_v26 = vmul.f32 %v1868_v23, %v1449_v9  ;;  %v2481_v20 = vadd.f32 %v2480_v14, %v2344_v13  ;;  %2247 = vperm.xlu1 %3021, %v1653_v10   ;;  %2167 = vperm.xlu0 %3020, %v1637_v15   ;;  %v2346_v29 = vmul.f32 %v1873_v19, %v1450_v22  ;;  %v1460_v15 = vld [vmem:[%s3717_s8 + $0x198] sm:$0xff]  ;;  %v2473_v23 = vrot.slane %v2472_v7, 1 }
 0x17c   : > { %v2451_v13 = vadd.f32 %v2450_v2, %v2449_v56  ;;  %v1468_v2 = vld [vmem:[%s3717_s8 + $0x1d8] sm:$0xff] }
 0x17d   : > { %v2482_v30 = vadd.f32 %v2481_v20, %v2345_v26  ;;  %v1461_v26 = vld [vmem:[%s3717_s8 + $0x1a0] sm:$0xff]  ;;  %v1659_v20 = vld [vmem:[%s3719_s9 + $0x3d0] sm:$0xff] }
 0x17e   : > { %v1883_v34 = vpop.permute.xlu1 %1882  ;;  %v1878_v36 = vpop.permute.xlu0 %1877 }
 0x17f   : > { %v2347_v40 = vmul.f32 %v1878_v36, %v1451_v27  ;;  %v2483_v41 = vadd.f32 %v2482_v30, %v2346_v29  ;;  %2252 = vperm.xlu1 %3021, %v1654_v28   ;;  %2172 = vperm.xlu0 %3020, %v1638_v12   ;;  %v2348_v43 = vmul.f32 %v1883_v34, %v1452_v35  ;;  %v1643_v29 = vld [vmem:[%s3719_s9 + $0x350] sm:$0xff]  ;;  %v2452_v30 = vrot.slane %v2451_v13, 1 }
 0x181   : > { %v2484_v44 = vadd.f32 %v2483_v41, %v2347_v40  ;;  %v2474_v41 = vadd.f32 %v2473_v23, %v2472_v7  ;;  %v2453_v46 = vadd.f32 %v2452_v30, %v2451_v13  ;;  %v1648_v23 = vld [vmem:[%s3719_s9 + $0x378] sm:$0xff]  ;;  %v1473_v30 = vld [vmem:[%s3717_s8 + $0x200] sm:$0xff] }
 0x182   : > { %v1893_v17 = vpop.permute.xlu1 %1892  ;;  %v1888_v48 = vpop.permute.xlu0 %1887 }
 0x183   : > { %v2349_v49 = vmul.f32 %v1888_v48, %v1453_v38  ;;  %v2485_v50 = vadd.f32 %v2484_v44, %v2348_v43  ;;  %2257 = vperm.xlu1 %3021, %v1655_v42   ;;  %2177 = vperm.xlu0 %3020, %v1639_v45   ;;  %v2350_v53 = vmul.f32 %v1893_v17, %v1454_v47  ;;  %v1660_v38 = vld [vmem:[%s3719_s9 + $0x3d8] sm:$0xff] }
 0x184   : > { %v1644_v45 = vld [vmem:[%s3719_s9 + $0x358] sm:$0xff] }
 0x185   : > { %v2486_v54 = vadd.f32 %v2485_v50, %v2349_v49  ;;  %v1464_v47 = vld [vmem:[%s3717_s8 + $0x1b8] sm:$0xff] }
 0x186   : > { %v1903_v57 = vpop.permute.xlu1 %1902  ;;  %v1898_v16 = vpop.permute.xlu0 %1897 }
 0x187   : > { %v2351_v59 = vmul.f32 %v1898_v16, %v1455_v52  ;;  %v2487_v60 = vadd.f32 %v2486_v54, %v2350_v53  ;;  %2262 = vperm.xlu1 %3021, %v1656_v24   ;;  %2182 = vperm.xlu0 %3020, %v1640_v55   ;;  %v2352_v63 = vmul.f32 %v1903_v57, %v1456_v58  ;;  %v1465_v24 = vld [vmem:[%s3717_s8 + $0x1c0] sm:$0xff]  ;;  %v1466_v16 = vld [vmem:[%s3717_s8 + $0x1c8] sm:$0xff] }
 0x188   : > { %v2610_v52 = vsel %vm2609_vm0, %v2474_v41, %v2453_v46  ;;  %v1661_v53 = vld [vmem:[%s3719_s9 + $0x3e0] sm:$0xff] }
 0x189   : > { %v2488_v0 = vadd.f32 %v2487_v60, %v2351_v59  ;;  %v1645_v57 = vld [vmem:[%s3719_s9 + $0x360] sm:$0xff] }
 0x18a   : > { %v1913_v3 = vpop.permute.xlu1 %1912  ;;  %v1908_v4 = vpop.permute.xlu0 %1907 }
 0x18b   : > { %v2489_v5 = vadd.f32 %v2488_v0, %v2352_v63  ;;  %v2354_v6 = vmul.f32 %v1913_v3, %v1458_v37  ;;  %v2353_v21 = vmul.f32 %v1908_v4, %v1457_v32  ;;  %2267 = vperm.xlu1 %3021, %v1657_v62   ;;  %2187 = vperm.xlu0 %3020, %v1641_v1   ;;  %v1467_v37 = vld [vmem:[%s3717_s8 + $0x1d0] sm:$0xff]  ;;  %v1662_v32 = vld [vmem:[%s3719_s9 + $0x3e8] sm:$0xff] }
 0x18c   : > { %v1646_v0 = vld [vmem:[%s3719_s9 + $0x368] sm:$0xff] }
 0x18d   : > { %v2490_v9 = vrot.slane %v2489_v5, 4  ;;  %v2496_v10 = vadd.f32 %v2354_v6, %v2353_v21  ;;  %v1469_v6 = vld [vmem:[%s3717_s8 + $0x1e0] sm:$0xff]  ;;  %v1663_v21 = vld [vmem:[%s3719_s9 + $0x3f0] sm:$0xff] }
 0x18e   : > { %v1923_v14 = vpop.permute.xlu1 %1922  ;;  %v1918_v18 = vpop.permute.xlu0 %1917 }
 0x18f   : > { %v2491_v19 = vadd.f32 %v2490_v9, %v2489_v5  ;;  %v2355_v22 = vmul.f32 %v1918_v18, %v1459_v8  ;;  %2272 = vperm.xlu1 %3021, %v1658_v31   ;;  %2192 = vperm.xlu0 %3020, %v1642_v11   ;;  %v2356_v27 = vmul.f32 %v1923_v14, %v1460_v15  ;;  %v1647_v31 = vld [vmem:[%s3719_s9 + $0x370] sm:$0xff]  ;;  %v1664_v18 = vld [vmem:[%s3719_s9 + $0x3f8] sm:$0xff] }
 0x190   : > { %v1471_v15 = vld [vmem:[%s3717_s8 + $0x1f0] sm:$0xff] }
 0x191   : > { %v2492_v39 = vrot.slane %v2491_v19, 2  ;;  %v2497_v28 = vadd.f32 %v2496_v10, %v2355_v22  ;;  %v1470_v10 = vld [vmem:[%s3717_s8 + $0x1e8] sm:$0xff] }
 0x192   : > { %v1933_v12 = vpop.permute.xlu1 %1932  ;;  %v1928_v34 = vpop.permute.xlu0 %1927 }
 0x193   : > { %v2493_v35 = vadd.f32 %v2492_v39, %v2491_v19  ;;  %v2357_v36 = vmul.f32 %v1928_v34, %v1461_v26  ;;  %v2498_v40 = vadd.f32 %v2497_v28, %v2356_v27  ;;  %2277 = vperm.xlu1 %3021, %v1659_v20   ;;  %2197 = vperm.xlu0 %3020, %v1643_v29   ;;  %v1472_v20 = vld [vmem:[%s3717_s8 + $0x1f8] sm:$0xff]  ;;  %v1474_v29 = vld [vmem:[%s3717_s8 + $0x208] sm:$0xff] }
 0x194   : > { %v2358_v43 = vmul.f32 %v1933_v12, %v1462_v33 }
 0x195   : > { %v2494_v42 = vrot.slane %v2493_v35, 1  ;;  %v2499_v44 = vadd.f32 %v2498_v40, %v2357_v36 }
 0x196   : > { %v1943_v17 = vpop.permute.xlu1 %1942  ;;  %v1938_v48 = vpop.permute.xlu0 %1937 }
 0x197   : > { %v2495_v49 = vadd.f32 %v2494_v42, %v2493_v35  ;;  %v2359_v50 = vmul.f32 %v1938_v48, %v1463_v25  ;;  %v2500_v51 = vadd.f32 %v2499_v44, %v2358_v43  ;;  %2282 = vperm.xlu1 %3021, %v1660_v38   ;;  %2202 = vperm.xlu0 %3020, %v1644_v45   ;;  %v1475_v25 = vld [vmem:[%s3717_s8 + $0x210] sm:$0xff]  ;;  %v1476_v44 = vld [vmem:[%s3717_s8 + $0x218] sm:$0xff] }
 0x198   : > { %v2360_v55 = vmul.f32 %v1943_v17, %v1464_v47  ;;  %v1477_v47 = vld [vmem:[%s3717_s8 + $0x220] sm:$0xff] }
 0x199   : > { %v3940_v54 = vsel %vm2611_vm1, %v2495_v49, %v2610_v52  ;;  %v2501_v56 = vadd.f32 %v2500_v51, %v2359_v50  ;;  %v1478_v52 = vld [vmem:[%s3717_s8 + $0x228] sm:$0xff] }
 0x19a   : > { %v1953_v58 = vpop.permute.xlu1 %1952  ;;  %v1948_v59 = vpop.permute.xlu0 %1947 }
 0x19b   : > { %v2361_v60 = vmul.f32 %v1948_v59, %v1465_v24  ;;  %v2502_v61 = vadd.f32 %v2501_v56, %v2360_v55  ;;  %2287 = vperm.xlu1 %3021, %v1661_v53   ;;  %2207 = vperm.xlu0 %3020, %v1645_v57   ;;  %v2362_v62 = vmul.f32 %v1953_v58, %v1466_v16  ;;  %v1479_v57 = vld [vmem:[%s3717_s8 + $0x230] sm:$0xff] }
 0x19d   : > { %v2503_v63 = vadd.f32 %v2502_v61, %v2361_v60  ;;  %v1480_v61 = vld [vmem:[%s3717_s8 + $0x238] sm:$0xff] }
 0x19e   : > { %v1963_v1 = vpop.permute.xlu1 %1962  ;;  %v1958_v3 = vpop.permute.xlu0 %1957 }
 0x19f   : > { %v2363_v4 = vmul.f32 %v1958_v3, %v1467_v37  ;;  %v2504_v5 = vadd.f32 %v2503_v63, %v2362_v62  ;;  %2292 = vperm.xlu1 %3021, %v1662_v32   ;;  %2212 = vperm.xlu0 %3020, %v1646_v0   ;;  %v2364_v7 = vmul.f32 %v1963_v1, %v1468_v2  ;;  %v1481_v0 = vld [vmem:[%s3717_s8 + $0x240] sm:$0xff] }
 0x1a1   : > { %v2505_v8 = vadd.f32 %v2504_v5, %v2363_v4  ;;  %v1482_v5 = vld [vmem:[%s3717_s8 + $0x248] sm:$0xff] }
 0x1a2   : > { %v1973_v9 = vpop.permute.xlu1 %1972  ;;  %v1968_v11 = vpop.permute.xlu0 %1967 }
 0x1a3   : > { %v2365_v13 = vmul.f32 %v1968_v11, %v1469_v6  ;;  %v2506_v14 = vadd.f32 %v2505_v8, %v2364_v7  ;;  %2297 = vperm.xlu1 %3021, %v1663_v21   ;;  %2217 = vperm.xlu0 %3020, %v1647_v31   ;;  %v2366_v19 = vmul.f32 %v1973_v9, %v1470_v10  ;;  %v1483_v8 = vld [vmem:[%s3717_s8 + $0x250] sm:$0xff]  ;;  %v1484_v11 = vld [vmem:[%s3717_s8 + $0x258] sm:$0xff] }
 0x1a5   : > { %v2507_v22 = vadd.f32 %v2506_v14, %v2365_v13 }
 0x1a6   : > { %v1983_v26 = vpop.permute.xlu1 %1982  ;;  %v1978_v39 = vpop.permute.xlu0 %1977 }
 0x1a7   : > { %v2367_v27 = vmul.f32 %v1978_v39, %v1471_v15  ;;  %v2508_v28 = vadd.f32 %v2507_v22, %v2366_v19  ;;  %2302 = vperm.xlu1 %3021, %v1664_v18   ;;  %2222 = vperm.xlu0 %3020, %v1648_v23   ;;  %v2368_v12 = vmul.f32 %v1983_v26, %v1472_v20  ;;  %v1486_v23 = vld [vmem:[%s3717_s8 + $0x268] sm:$0xff] }
 0x1a9   : > { %v2509_v33 = vadd.f32 %v2508_v28, %v2367_v27  ;;  %v1487_v27 = vld [vmem:[%s3717_s8 + $0x270] sm:$0xff] }
 0x1aa   : > { %v1993_v34 = vpop.permute.xlu1 %1992  ;;  %v1988_v35 = vpop.permute.xlu0 %1987 }
 0x1ab   : > { %v2510_v36 = vadd.f32 %v2509_v33, %v2368_v12  ;;  %v2370_v40 = vmul.f32 %v1993_v34, %v1474_v29  ;;  %v2369_v41 = vmul.f32 %v1988_v35, %v1473_v30  ;;  %v1488_v12 = vld [vmem:[%s3717_s8 + $0x278] sm:$0xff] }
 0x1ad   : > { %v2511_v38 = vrot.slane %v2510_v36, 4  ;;  %v2517_v42 = vadd.f32 %v2370_v40, %v2369_v41 }
 0x1ae   : > { %v2003_v43 = vpop.permute.xlu1 %2002  ;;  %v1998_v45 = vpop.permute.xlu0 %1997 }
 0x1af   : > { %v2512_v46 = vadd.f32 %v2511_v38, %v2510_v36  ;;  %v2371_v17 = vmul.f32 %v1998_v45, %v1475_v25  ;;  %v2372_v49 = vmul.f32 %v2003_v43, %v1476_v44 }
 0x1b1   : > { %v2513_v48 = vrot.slane %v2512_v46, 2  ;;  %v2518_v50 = vadd.f32 %v2517_v42, %v2371_v17 }
 0x1b2   : > { %v2013_v51 = vpop.permute.xlu1 %2012  ;;  %v2008_v24 = vpop.permute.xlu0 %2007 }
 0x1b3   : > { %v2514_v53 = vadd.f32 %v2513_v48, %v2512_v46  ;;  %v2373_v55 = vmul.f32 %v2008_v24, %v1477_v47  ;;  %v2519_v56 = vadd.f32 %v2518_v50, %v2372_v49  ;;  %v2374_v16 = vmul.f32 %v2013_v51, %v1478_v52 }
 0x1b5   : > { %v2515_v58 = vrot.slane %v2514_v53, 1  ;;  %v2520_v59 = vadd.f32 %v2519_v56, %v2373_v55  ;;  %v1490_v56 = vld [vmem:[%s3717_s8 + $0x288] sm:$0xff] }
 0x1b6   : > { %v2023_v60 = vpop.permute.xlu1 %2022  ;;  %v2018_v37 = vpop.permute.xlu0 %2017 }
 0x1b7   : > { %v2516_v32 = vadd.f32 %v2515_v58, %v2514_v53  ;;  %v2375_v62 = vmul.f32 %v2018_v37, %v1479_v57  ;;  %v2521_v63 = vadd.f32 %v2520_v59, %v2374_v16  ;;  %v2376_v2 = vmul.f32 %v2023_v60, %v1480_v61  ;;  %v1489_v57 = vld [vmem:[%s3717_s8 + $0x280] sm:$0xff]  ;;  %v1491_v59 = vld [vmem:[%s3717_s8 + $0x290] sm:$0xff] }
 0x1b9   : > { %v2614_v1 = vsel %vm2613_vm2, %v2516_v32, %v3940_v54  ;;  %v2522_v3 = vadd.f32 %v2521_v63, %v2375_v62  ;;  %v1485_v54 = vld [vmem:[%s3717_s8 + $0x260] sm:$0xff] }
 0x1ba   : > { %v2033_v4 = vpop.permute.xlu1 %2032  ;;  %v2028_v6 = vpop.permute.xlu0 %2027 }
 0x1bb   : > { %v2377_v21 = vmul.f32 %v2028_v6, %v1481_v0  ;;  %v2523_v7 = vadd.f32 %v2522_v3, %v2376_v2  ;;  %v2378_v31 = vmul.f32 %v2033_v4, %v1482_v5  ;;  %v1492_v0 = vld [vmem:[%s3717_s8 + $0x298] sm:$0xff]  ;;  %v1493_v4 = vld [vmem:[%s3717_s8 + $0x2a0] sm:$0xff] }
 0x1bd   : > { %v2524_v9 = vadd.f32 %v2523_v7, %v2377_v21 }
 0x1be   : > { %v2043_v10 = vpop.permute.xlu1 %2042  ;;  %v2038_v13 = vpop.permute.xlu0 %2037 }
 0x1bf   : > { %v2379_v14 = vmul.f32 %v2038_v13, %v1483_v8  ;;  %v2525_v15 = vadd.f32 %v2524_v9, %v2378_v31  ;;  %v2380_v18 = vmul.f32 %v2043_v10, %v1484_v11  ;;  %v1494_v31 = vld [vmem:[%s3717_s8 + $0x2a8] sm:$0xff]  ;;  %v1495_v13 = vld [vmem:[%s3717_s8 + $0x2b0] sm:$0xff] }
 0x1c1   : > { %v2526_v19 = vadd.f32 %v2525_v15, %v2379_v14 }
 0x1c2   : > { %v2053_v22 = vpop.permute.xlu1 %2052  ;;  %v2048_v26 = vpop.permute.xlu0 %2047 }
 0x1c3   : > { %v2381_v20 = vmul.f32 %v2048_v26, %v1485_v54  ;;  %v2527_v39 = vadd.f32 %v2526_v19, %v2380_v18  ;;  %v2382_v28 = vmul.f32 %v2053_v22, %v1486_v23  ;;  %v1496_v22 = vld [vmem:[%s3717_s8 + $0x2b8] sm:$0xff] }
 0x1c5   : > { %v2528_v29 = vadd.f32 %v2527_v39, %v2381_v20  ;;  %v1497_v39 = vld [vmem:[%s3717_s8 + $0x2c0] sm:$0xff] }
 0x1c6   : > { %v2063_v30 = vpop.permute.xlu1 %2062  ;;  %v2058_v33 = vpop.permute.xlu0 %2057 }
 0x1c7   : > { %v2383_v34 = vmul.f32 %v2058_v33, %v1487_v27  ;;  %v2529_v35 = vadd.f32 %v2528_v29, %v2382_v28  ;;  %v2384_v36 = vmul.f32 %v2063_v30, %v1488_v12  ;;  %v1498_v33 = vld [vmem:[%s3717_s8 + $0x2c8] sm:$0xff] }
 0x1c9   : > { %v2530_v40 = vadd.f32 %v2529_v35, %v2383_v34 }
 0x1ca   : > { %v2073_v41 = vpop.permute.xlu1 %2072  ;;  %v2068_v25 = vpop.permute.xlu0 %2067 }
 0x1cb   : > { %v2531_v38 = vadd.f32 %v2530_v40, %v2384_v36  ;;  %v2386_v60 = vmul.f32 %v2073_v41, %v1490_v56  ;;  %v2385_v61 = vmul.f32 %v2068_v25, %v1489_v57  ;;  %v1499_v40 = vld [vmem:[%s3717_s8 + $0x2d0] sm:$0xff]  ;;  %v1522_v25 = vld [vmem:[%s3717_s8 + $0x388] sm:$0xff]  ;;  %v1501_v57 = vld [vmem:[%s3717_s8 + $0x2e0] sm:$0xff] }
 0x1cd   : > { %v2532_v42 = vrot.slane %v2531_v38, 4  ;;  %v2538_v63 = vadd.f32 %v2386_v60, %v2385_v61 }
 0x1ce   : > { %v2083_v43 = vpop.permute.xlu1 %2082  ;;  %v2078_v44 = vpop.permute.xlu0 %2077 }
 0x1cf   : > { %v2533_v45 = vadd.f32 %v2532_v42, %v2531_v38  ;;  %v2387_v62 = vmul.f32 %v2078_v44, %v1491_v59  ;;  %v2388_v5 = vmul.f32 %v2083_v43, %v1492_v0  ;;  %v1521_v38 = vld [vmem:[%s3717_s8 + $0x380] sm:$0xff] }
 0x1d1   : > { %v2534_v46 = vrot.slane %v2533_v45, 2  ;;  %v2539_v3 = vadd.f32 %v2538_v63, %v2387_v62  ;;  %v1524_v63 = vld [vmem:[%s3717_s8 + $0x398] sm:$0xff] }
 0x1d2   : > { %v2093_v17 = vpop.permute.xlu1 %2092  ;;  %v2088_v47 = vpop.permute.xlu0 %2087 }
 0x1d3   : > { %v2535_v48 = vadd.f32 %v2534_v46, %v2533_v45  ;;  %v2389_v7 = vmul.f32 %v2088_v47, %v1493_v4  ;;  %v2540_v8 = vadd.f32 %v2539_v3, %v2388_v5  ;;  %v2390_v14 = vmul.f32 %v2093_v17, %v1494_v31  ;;  %v1523_v46 = vld [vmem:[%s3717_s8 + $0x390] sm:$0xff]  ;;  %v1506_v17 = vld [vmem:[%s3717_s8 + $0x308] sm:$0xff]  ;;  %v1505_v47 = vld [vmem:[%s3717_s8 + $0x300] sm:$0xff] }
 0x1d4   : > { %v1525_v31 = vld [vmem:[%s3717_s8 + $0x3a0] sm:$0xff] }
 0x1d5   : > { %v2536_v49 = vrot.slane %v2535_v48, 1  ;;  %v2541_v11 = vadd.f32 %v2540_v8, %v2389_v7 }
 0x1d6   : > { %v2103_v50 = vpop.permute.xlu1 %2102  ;;  %v2098_v51 = vpop.permute.xlu0 %2097 }
 0x1d7   : > { %v2537_v52 = vadd.f32 %v2536_v49, %v2535_v48  ;;  %v2391_v54 = vmul.f32 %v2098_v51, %v1495_v13  ;;  %v2542_v18 = vadd.f32 %v2541_v11, %v2390_v14  ;;  %v2392_v27 = vmul.f32 %v2103_v50, %v1496_v22  ;;  %v1500_v50 = vld [vmem:[%s3717_s8 + $0x2d8] sm:$0xff]  ;;  %v1526_v14 = vld [vmem:[%s3717_s8 + $0x3a8] sm:$0xff]  ;;  %v1503_v22 = vld [vmem:[%s3717_s8 + $0x2f0] sm:$0xff] }
 0x1d9   : > { %v3973_v24 = vsel %vm2615_vm3, %v2537_v52, %v2614_v1  ;;  %v2543_v26 = vadd.f32 %v2542_v18, %v2391_v54  ;;  %v1510_v18 = vld [vmem:[%s3717_s8 + $0x328] sm:$0xff] }
 0x1da   : > { %v2113_v53 = vpop.permute.xlu1 %2112  ;;  %v2108_v55 = vpop.permute.xlu0 %2107 }
 0x1db   : > { %v2393_v29 = vmul.f32 %v2108_v55, %v1497_v39  ;;  %v2544_v30 = vadd.f32 %v2543_v26, %v2392_v27  ;;  %v2394_v41 = vmul.f32 %v2113_v53, %v1498_v33  ;;  %v1507_v55 = vld [vmem:[%s3717_s8 + $0x310] sm:$0xff] }
 0x1dc   : > { %v1527_v39 = vld [vmem:[%s3717_s8 + $0x3b0] sm:$0xff] }
 0x1dd   : > { %v2545_v35 = vadd.f32 %v2544_v30, %v2393_v29  ;;  %v1511_v29 = vld [vmem:[%s3717_s8 + $0x330] sm:$0xff] }
 0x1de   : > { %v3977_v58 = vpop.permute.xlu1 %2122  ;;  %v2118_v16 = vpop.permute.xlu0 %2117 }
 0x1df   : > { %v2395_v43 = vmul.f32 %v2118_v16, %v1499_v40  ;;  %v2546_v44 = vadd.f32 %v2545_v35, %v2394_v41  ;;  %v2396_v60 = vmul.f32 %v3977_v58, %v1500_v50  ;;  %v1502_v58 = vld [vmem:[%s3717_s8 + $0x2e8] sm:$0xff]  ;;  %v1528_v35 = vld [vmem:[%s3717_s8 + $0x3b8] sm:$0xff] }
 0x1e1   : > { %v2547_v52 = vadd.f32 %v2546_v44, %v2395_v43 }
 0x1e2   : > { %v3980_v37 = vpop.permute.xlu1 %2132  ;;  %v3982_v32 = vpop.permute.xlu0 %2127 }
 0x1e3   : > { %v2397_v3 = vmul.f32 %v3982_v32, %v1501_v57  ;;  %v2548_v4 = vadd.f32 %v2547_v52, %v2396_v60 }
 0x1e6   : > { %v3985_v1 = vpop.permute.xlu1 %2142  ;;  %v3987_v2 = vpop.permute.xlu0 %2137 }
 0x1e7   : > { %v2399_v40 = vmul.f32 %v3987_v2, %v1503_v22  ;;  %v1518_v22 = vld [vmem:[%s3717_s8 + $0x368] sm:$0xff] }
 0x1ea   : > { %v2153_v6 = vpop.permute.xlu1 %2152  ;;  %v2148_v21 = vpop.permute.xlu0 %2147 }
 0x1eb   : > { %v2402_v59 = vmul.f32 %v2153_v6, %v1506_v17  ;;  %v2401_v16 = vmul.f32 %v2148_v21, %v1505_v47  ;;  %v1508_v6 = vld [vmem:[%s3717_s8 + $0x318] sm:$0xff]  ;;  %v1509_v21 = vld [vmem:[%s3717_s8 + $0x320] sm:$0xff] }
 0x1ec   : > { %v1513_v17 = vld [vmem:[%s3717_s8 + $0x340] sm:$0xff]  ;;  %v1504_v47 = vld [vmem:[%s3717_s8 + $0x2f8] sm:$0xff] }
 0x1ed   : > { %v2559_v8 = vadd.f32 %v2402_v59, %v2401_v16  ;;  %v1531_v59 = vld [vmem:[%s3717_s8 + $0x3d0] sm:$0xff] }
 0x1ee   : > { %v3991_v9 = vpop.permute.xlu1 %2162  ;;  %v2158_v10 = vpop.permute.xlu0 %2157 }
 0x1ef   : > { %v2403_v62 = vmul.f32 %v2158_v10, %v1507_v55  ;;  %v2404_v26 = vmul.f32 %v3991_v9, %v1508_v6  ;;  %v1512_v9 = vld [vmem:[%s3717_s8 + $0x338] sm:$0xff]  ;;  %v1514_v55 = vld [vmem:[%s3717_s8 + $0x348] sm:$0xff] }
 0x1f1   : > { %v2560_v13 = vadd.f32 %v2559_v8, %v2403_v62  ;;  %v1516_v8 = vld [vmem:[%s3717_s8 + $0x358] sm:$0xff] }
 0x1f2   : > { %v2233_v15 = vpop.permute.xlu1 %2232  ;;  %v2228_v19 = vpop.permute.xlu0 %2227 }
 0x1f3   : > { %v2418_v48 = vmul.f32 %v2233_v15, %v1522_v25  ;;  %v2417_v49 = vmul.f32 %v2228_v19, %v1521_v38  ;;  %v2549_v15 = vadd.f32 %v2548_v4, %v2397_v3  ;;  %v2561_v30 = vadd.f32 %v2560_v13, %v2404_v26 }
 0x1f5   : > { %v2580_v61 = vadd.f32 %v2418_v48, %v2417_v49  ;;  %v1530_v49 = vld [vmem:[%s3717_s8 + $0x3c8] sm:$0xff] }
 0x1f6   : > { %v2243_v23 = vpop.permute.xlu1 %2242  ;;  %v2238_v20 = vpop.permute.xlu0 %2237 }
 0x1f7   : > { %v2419_v56 = vmul.f32 %v2238_v20, %v1523_v46  ;;  %v2420_v11 = vmul.f32 %v2243_v23, %v1524_v63  ;;  %v2398_v23 = vmul.f32 %v3980_v37, %v1502_v58  ;;  %v1529_v37 = vld [vmem:[%s3717_s8 + $0x3c0] sm:$0xff]  ;;  %v1532_v63 = vld [vmem:[%s3717_s8 + $0x3d8] sm:$0xff] }
 0x1f8   : > { %v1517_v58 = vld [vmem:[%s3717_s8 + $0x360] sm:$0xff] }
 0x1f9   : > { %v2581_v5 = vadd.f32 %v2580_v61, %v2419_v56  ;;  %v2550_v41 = vadd.f32 %v2549_v15, %v2398_v23  ;;  %v1515_v61 = vld [vmem:[%s3717_s8 + $0x350] sm:$0xff]  ;;  %v1534_v15 = vld [vmem:[%s3717_s8 + $0x3e8] sm:$0xff] }
 0x1fa   : > { %v2248_v28 = vpop.permute.xlu1 %2247  ;;  %v2168_v12 = vpop.permute.xlu0 %2167 }
 0x1fb   : > { %v2421_v54 = vmul.f32 %v2248_v28, %v1525_v31  ;;  %v2582_v32 = vadd.f32 %v2581_v5, %v2420_v11  ;;  %v2405_v20 = vmul.f32 %v2168_v12, %v1509_v21  ;;  %v2551_v50 = vadd.f32 %v2550_v41, %v2399_v40  ;;  %v1533_v11 = vld [vmem:[%s3717_s8 + $0x3e0] sm:$0xff] }
 0x1fd   : > { %v2583_v25 = vadd.f32 %v2582_v32, %v2421_v54  ;;  %v2562_v43 = vadd.f32 %v2561_v30, %v2405_v20 }
 0x1fe   : > { %v2253_v34 = vpop.permute.xlu1 %2252  ;;  %v2173_v36 = vpop.permute.xlu0 %2172 }
 0x1ff   : > { %v2422_v27 = vmul.f32 %v2253_v34, %v1526_v14  ;;  %v2406_v33 = vmul.f32 %v2173_v36, %v1510_v18 }
 0x201   : > { %v2584_v34 = vadd.f32 %v2583_v25, %v2422_v27  ;;  %v2563_v36 = vadd.f32 %v2562_v43, %v2406_v33 }
 0x202   : > { %v2258_v42 = vpop.permute.xlu1 %2257  ;;  %v2178_v45 = vpop.permute.xlu0 %2177 }
 0x203   : > { %v2423_v38 = vmul.f32 %v2258_v42, %v1527_v39  ;;  %v2407_v44 = vmul.f32 %v2178_v45, %v1511_v29  ;;  %v1535_v39 = vld [vmem:[%s3717_s8 + $0x3f0] sm:$0xff] }
 0x204   : > { %v1519_v29 = vld [vmem:[%s3717_s8 + $0x370] sm:$0xff] }
 0x205   : > { %v2585_v52 = vadd.f32 %v2584_v34, %v2423_v38  ;;  %v2564_v57 = vadd.f32 %v2563_v36, %v2407_v44  ;;  %v1520_v44 = vld [vmem:[%s3717_s8 + $0x378] sm:$0xff] }
 0x206   : > { %v2263_v51 = vpop.permute.xlu1 %2262  ;;  %v2183_v53 = vpop.permute.xlu0 %2182 }
 0x207   : > { %v2424_v46 = vmul.f32 %v2263_v51, %v1528_v35  ;;  %v2408_v48 = vmul.f32 %v2183_v53, %v1512_v9  ;;  %v2400_v51 = vmul.f32 %v3985_v1, %v1504_v47 }
 0x209   : > { %v2586_v16 = vadd.f32 %v2585_v52, %v2424_v46  ;;  %v2565_v53 = vadd.f32 %v2564_v57, %v2408_v48  ;;  %v2552_v4 = vadd.f32 %v2551_v50, %v2400_v51 }
 0x20a   : > { %v2268_v0 = vpop.permute.xlu1 %2267  ;;  %v2188_v7 = vpop.permute.xlu0 %2187 }
 0x20b   : > { %v2425_v42 = vmul.f32 %v2268_v0, %v1529_v37  ;;  %v2409_v45 = vmul.f32 %v2188_v7, %v1513_v17  ;;  %v2553_v54 = vrot.slane %v2552_v4, 4 }
 0x20d   : > { %v2587_v0 = vadd.f32 %v2586_v16, %v2425_v42  ;;  %v2566_v7 = vadd.f32 %v2565_v53, %v2409_v45 }
 0x20e   : > { %v2273_v10 = vpop.permute.xlu1 %2272  ;;  %v2193_v19 = vpop.permute.xlu0 %2192 }
 0x20f   : > { %v2426_v60 = vmul.f32 %v2273_v10, %v1530_v49  ;;  %v2410_v62 = vmul.f32 %v2193_v19, %v1514_v55 }
 0x211   : > { %v2588_v1 = vadd.f32 %v2587_v0, %v2426_v60  ;;  %v2567_v13 = vadd.f32 %v2566_v7, %v2410_v62  ;;  %v1408_v0 = vld [vmem:[#allocation2] sm:$0xff] }
 0x212   : > { %v2278_v28 = vpop.permute.xlu1 %2277  ;;  %v2198_v12 = vpop.permute.xlu0 %2197  ;;  %v2630_v7 = vld [vmem:[%s4145_s2] sm:$0xff] (!%p2882_p10) }
 0x213   : > { %v2427_v5 = vmul.f32 %v2278_v28, %v1531_v59  ;;  %v2411_v6 = vmul.f32 %v2198_v12, %v1515_v61  ;;  %v2554_v28 = vadd.f32 %v2553_v54, %v2552_v4  ;;  %v1536_v12 = vld [vmem:[%s3717_s8 + $0x3f8] sm:$0xff]  ;;  %v2646_v54 = vld [vmem:[%s4146_s3 + $0x28] sm:$0xff] (!%p2882_p10) }
 0x215   : > { %v2589_v32 = vadd.f32 %v2588_v1, %v2427_v5  ;;  %v2568_v26 = vadd.f32 %v2567_v13, %v2411_v6  ;;  %v2555_v46 = vrot.slane %v2554_v28, 2  ;;  %v2641_v6 = vld [vmem:[%s4146_s3] sm:$0xff] (!%p2882_p10)  ;;  %v2631_v1 = vmax.f32 (!%p2882_p10), %v2630_v7, 1.0  ;;  %v2643_v13 = vld [vmem:[%s4146_s3 + $0x10] sm:$0xff] (!%p2882_p10) }
 0x216   : > { %v2283_v2 = vpop.permute.xlu1 %2282  ;;  %v2203_v56 = vpop.permute.xlu0 %2202 }
 0x217   : > { %v2428_v21 = vmul.f32 %v2283_v2, %v1532_v63  ;;  %v2412_v14 = vmul.f32 %v2203_v56, %v1516_v8  ;;  %v2556_v52 = vadd.f32 %v2555_v46, %v2554_v28 }
 0x219   : > { %v2590_v23 = vadd.f32 %v2589_v32, %v2428_v21  ;;  %v2569_v30 = vadd.f32 %v2568_v26, %v2412_v14  ;;  %v2557_v45 = vrot.slane %v2556_v52, 1  ;;  %v3098_v21 = vmov (!%p2882_p10), 0.0|0.0   ;;  %v2644_v14 = vld [vmem:[%s4146_s3 + $0x18] sm:$0xff] (!%p2882_p10) }
 0x21a   : > { %v2288_v3 = vpop.permute.xlu1 %2287  ;;  %v2208_v31 = vpop.permute.xlu0 %2207  ;;  %2943 = vmatprep.subr.bf16.mxu0 (!%p2882_p10), %v3098_v21  ;;  %v3100_v32 = vmov (!%p2882_p10), 0.0  }
 0x21b   : > { %v2429_v18 = vmul.f32 %v2288_v3, %v1533_v11  ;;  %v2413_v20 = vmul.f32 %v2208_v31, %v1517_v58  ;;  %v2558_v61 = vadd.f32 %v2557_v45, %v2556_v52  ;;  %v3097_v11 = vmov (!%p2882_p10), 0   ;;  %2940 = vmatprep.mubr.msk.f32.mxu0 (!%p2882_p10), %vm3099_vm7, %v3100_v32 }
 0x21c   : > { %3022 = vset.pattern.permute.xlu0 (!%p2882_p10), %v3097_v11 }
 0x21d   : > { %v2591_v40 = vadd.f32 %v2590_v23, %v2429_v18  ;;  %v2570_v38 = vadd.f32 %v2569_v30, %v2413_v20  ;;  %v2618_v4 = vsel %vm2617_vm4, %v2558_v61, %v3973_v24  ;;  %v2642_v24 = vld [vmem:[%s4146_s3 + $0x8] sm:$0xff] (!%p2882_p10)  ;;  %2635 = vperm.xlu0 (!%p2882_p10), %3022, %v2631_v1   ;;  %v2649_v20 = vld [vmem:[%s4146_s3 + $0x40] sm:$0xff] (!%p2882_p10) }
 0x21e   : > { %v2293_v10 = vpop.permute.xlu1 %2292  ;;  %v2213_v19 = vpop.permute.xlu0 %2212  ;;  %v2944_v58 = vpack.c.bf16 (!%p2882_p10), %v2642_v24, %v2641_v6 }
 0x21f   : > { %v2430_v27 = vmul.f32 %v2293_v10, %v1534_v15  ;;  %v2414_v33 = vmul.f32 %v2213_v19, %v1518_v22  ;;  %v2947_v10 = vpack.c.bf16 (!%p2882_p10), %v2644_v14, %v2643_v13  ;;  %v2645_v15 = vld [vmem:[%s4146_s3 + $0x20] sm:$0xff] (!%p2882_p10)  ;;  %v2647_v19 = vld [vmem:[%s4146_s3 + $0x30] sm:$0xff] (!%p2882_p10)  ;;  %v2648_v22 = vld [vmem:[%s4146_s3 + $0x38] sm:$0xff] (!%p2882_p10) }
 0x220   : > { %2945 = vmatpush3.bf16.msra.mxu0 (!%p2882_p10), %v2944_v58  ;;  %v2950_v18 = vpack.c.bf16 (!%p2882_p10), %v2646_v54, %v2645_v15  ;;  %v2953_v26 = vpack.c.bf16 (!%p2882_p10), %v2648_v22, %v2647_v19 }
 0x221   : > { %v2592_v43 = vadd.f32 %v2591_v40, %v2430_v27  ;;  %v2571_v37 = vadd.f32 %v2570_v38, %v2414_v33  ;;  %2946 = vmatprep.subr.bf16.mxu0 (!%p2882_p10), %v3098_v21  ;;  %v2651_v27 = vld [vmem:[%s4146_s3 + $0x50] sm:$0xff] (!%p2882_p10)  ;;  %v2653_v33 = vld [vmem:[%s4146_s3 + $0x60] sm:$0xff] (!%p2882_p10) }
 0x222   : > { %v2298_v35 = vpop.permute.xlu1 %2297  ;;  %v2218_v25 = vpop.permute.xlu0 %2217  ;;  %v2655_v40 = vld [vmem:[%s4146_s3 + $0x70] sm:$0xff] (!%p2882_p10) }
 0x223   : > { %v2431_v41 = vmul.f32 %v2298_v35, %v1535_v39  ;;  %v2415_v9 = vmul.f32 %v2218_v25, %v1519_v29  ;;  %v2650_v39 = vld [vmem:[%s4146_s3 + $0x48] sm:$0xff] (!%p2882_p10)  ;;  %v2652_v29 = vld [vmem:[%s4146_s3 + $0x58] sm:$0xff] (!%p2882_p10) }
 0x224   : > { %2948 = vmatpush3.bf16.msra.mxu0 (!%p2882_p10), %v2947_v10  ;;  %v2956_v23 = vpack.c.bf16 (!%p2882_p10), %v2650_v39, %v2649_v20  ;;  %v2959_v30 = vpack.c.bf16 (!%p2882_p10), %v2652_v29, %v2651_v27  ;;  %v2654_v35 = vld [vmem:[%s4146_s3 + $0x68] sm:$0xff] (!%p2882_p10) }
 0x225   : > { %v2593_v17 = vadd.f32 %v2592_v43, %v2431_v41  ;;  %v2572_v48 = vadd.f32 %v2571_v37, %v2415_v9  ;;  %2949 = vmatprep.subr.bf16.mxu0 (!%p2882_p10), %v3098_v21  ;;  %v2962_v28 = vpack.c.bf16 (!%p2882_p10), %v2654_v35, %v2653_v33  ;;  %v2656_v41 = vld [vmem:[%s4146_s3 + $0x78] sm:$0xff] (!%p2882_p10) }
 0x226   : > { %v2303_v34 = vpop.permute.xlu1 %2302  ;;  %v2223_v36 = vpop.permute.xlu0 %2222  ;;  %v2965_v25 = vpack.c.bf16 (!%p2882_p10), %v2656_v41, %v2655_v40 }
 0x227   : > { %v2432_v47 = vmul.f32 %v2303_v34, %v1536_v12  ;;  %v2416_v49 = vmul.f32 %v2223_v36, %v1520_v44  ;;  %v2883_v44 = vld [vmem:[%s4147_s4] ss:$0 sm:$0xff] (!%p2882_p10) }
 0x228   : > { %2951 = vmatpush3.bf16.msra.mxu0 (!%p2882_p10), %v2950_v18 }
 0x229   : > { %v2594_v2 = vadd.f32 %v2593_v17, %v2432_v47  ;;  %v2573_v50 = vadd.f32 %v2572_v48, %v2416_v49  ;;  %2952 = vmatprep.subr.bf16.mxu0 (!%p2882_p10), %v3098_v21 }
 0x22b   : > { %v2595_v42 = vrot.slane %v2594_v2, 4  ;;  %v2574_v55 = vrot.slane %v2573_v50, 4 }
 0x22c   : > { %2954 = vmatpush3.bf16.msra.mxu0 (!%p2882_p10), %v2953_v26 }
 0x22d   : > { %v2596_v56 = vadd.f32 %v2595_v42, %v2594_v2  ;;  %v2575_v57 = vadd.f32 %v2574_v55, %v2573_v50  ;;  %2955 = vmatprep.subr.bf16.mxu0 (!%p2882_p10), %v3098_v21 }
 0x22f   : > { %v2597_v59 = vrot.slane %v2596_v56, 2  ;;  %v2576_v51 = vrot.slane %v2575_v57, 2 }
 0x230   : > { %2957 = vmatpush3.bf16.msra.mxu0 (!%p2882_p10), %v2956_v23 }
 0x231   : > { %v2598_v16 = vadd.f32 %v2597_v59, %v2596_v56  ;;  %v2577_v60 = vadd.f32 %v2576_v51, %v2575_v57  ;;  %2958 = vmatprep.subr.bf16.mxu0 (!%p2882_p10), %v3098_v21 }
 0x233   : > { %v2599_v53 = vrot.slane %v2598_v16, 1  ;;  %v2578_v62 = vrot.slane %v2577_v60, 1 }
 0x234   : > { %2960 = vmatpush3.bf16.msra.mxu0 (!%p2882_p10), %v2959_v30 }
 0x235   : > { %v2600_v63 = vadd.f32 %v2599_v53, %v2598_v16  ;;  %v2579_v3 = vadd.f32 %v2578_v62, %v2577_v60  ;;  %2629 = sbr.rel (%p2882_p10) target bundleno = 897 (0x381), region = 124  ;;  %2961 = vmatprep.subr.bf16.mxu0 (!%p2882_p10), %v3098_v21 }
 0x237   : > { %v2620_v5 = vsel %vm2619_vm5, %v2579_v3, %v2618_v4 }
 0x238   : > { %v2622_v8 = vsel %vm2621_vm6, %v2600_v63, %v2620_v5  ;;  %2963 = vmatpush3.bf16.msra.mxu0 (!%p2882_p10), %v2962_v28 }
 0x239   : > { %v2624_v31 = vadd.f32 %v2622_v8, %v1408_v0  ;;  %2964 = vmatprep.subr.bf16.mxu0 (!%p2882_p10), %v3098_v21 }
 0x23b   : > { %2625 = vst [vmem:[#allocation2] sm:$0xff] %v2624_v31 }
 0x23c   : > { %2966 = vmatpush3.bf16.msra.mxu0 %v2965_v25 }
 0x242   : > { %v2632_v9 = vld [vmem:[#allocation2] sm:$0xff] }
 0x29c   : > { %v2636_v38 = vpop.permute.xlu0 %2635 }
 0x29d   : > { %3023 = vrcp.f32 %v2636_v38 }
 0x2a7   : > { %v3024_v12 = vpop.eup %3023 }
 0x2a8   : > { %v2639_v43 = vmul.f32 %v3024_v12, %v2632_v9 }
 0x2aa   : > { %2640 = vst [vmem:[#allocation5] sm:$0xff] %v2639_v43  ;;  %2941 = vmatmul.mubr.f32.vlgmr.msra.gmra.mrb[0].mxu0 %v2639_v43 }
 0x37d   : > { %v2730_v37 = vpop.f32.mrb[0].mxu0 }
 0x37e   : > { %v2731_v34 = vadd.f32 %v2883_v44, %v2730_v37  ;;  %v2942_v46 = vpop.f32.mrb[1].mxu0 }
 0x380   : > { %2735 = vst.msk [vmem:[%s4149_s6] sm:$0xff] %vm2734_vm8, %v2731_v34 }
 0x381 PF: > { %p4102_p11 = scmp.eq.s32.totalorder %s2868_s26, 1  ;;  %s3101_s12 = smov [#allocation5]  }
 0x382   : > { %s2749_s13 = sshll.u32 %s3101_s12, 4  ;;  %s2750_s13 = int_to_ptr.vmem [resolvable:$true] %s2749_s13 }
 0x383   : > { %s3025_s14 = scalar_lea.vmem %s2750_s13, 128  ;;  %p3032_p1 = scmp.lt.s32.totalorder %s2750_s13, %s2750_s13 }
 0x384   : > { %p3026_p12 = scmp.ne.s32.totalorder %s2750_s13, %s3025_s14  ;;  %p3033_p2 = scmp.lt.s32.totalorder %s3025_s14, %s3025_s14 }
 0x386   : > { %p3027_p13 = pnand %p3026_p12, %p4102_p11  ;;  %p3034_p3 = por %p3033_p2, %p3032_p1 }
 0x388   : > { %p3028_p0 = pneg %p3027_p13 }
 0x38a   : > { %p3035_p4 = pnand %p3034_p3, %p3028_p0 }
 0x38c   : > { %3038 = shalt.err (!%p3035_p4)
}
 0x38d   : > { %s3039_s26 = scalar_lea.hbm %s4148_s5, 128 }
 0x38e   : > { %p3040_p5 = scmp.ne.s32.totalorder %s4148_s5, %s3039_s26  ;;  %p3045_p8 = scmp.lt.u32.totalorder %s3039_s26, %s4148_s5 }
 0x390   : > { %p3041_p6 = pnand %p3040_p5, %p4102_p11 }
 0x392   : > { %p3042_p7 = pneg %p3041_p6 }
 0x394   : > { %p3047_p9 = pnand %p3045_p8, %p3042_p7 }
 0x396   : > { %3050 = shalt.err (!%p3047_p9)
}
 0x397   : > { %2968 = dma.vmem_to_hbm [thread:$0]  (%p4102_p11), %s2750_s13, 128, %s4148_s5, [#allocation6]  }
 0x398   : > { %3072 = dma.done.wait (%p4102_p11), [#allocation6], 128  }
 0x399   : > { %3074 = vsyncadd (%p4102_p11), [#allocation6], 4294967168 }
 0x39a PF: > { %s18_s25 = sadd.s32 1, %s3093_s25   ;;  %s4152_s21 = smov %s3081_s22 }
 0x39b   : > { %p15_p10 = scmp.ge.s32.totalorder %s18_s25, 4   ;;  %s4153_s22 = smov %s3177_s7 }
 0x39c   : > { %s4154_s23 = smov %s3089_s24  ;;  %s4155_s24 = smov %s4157_s27 }
 0x39d   :  { %17 = sbr.rel (!%p15_p10) target bundleno = 3 (0x3), region = 180 }
 0x3a4   :  { %2772 = vsyncpa [#allocation6], 1 }
 0x3a5   :  { %2774 = vsyncpa [#allocation6 + $0x1], 1 }

</bundles_post_ra>
